<compile_context>
chip_gen: v7x
topology: tpu7x:2x2x1
jax: 0.10.0
libtpu: 0.0.40
codegen_flags: <defaults>
</compile_context>

<pallas_src>
import functools

import numpy as np
import jax
import jax.numpy as jnp
from jax.experimental import pallas as pl
from jax.experimental.pallas import tpu as pltpu


def _logsigmoid(x):
    # Numerically stable log(sigmoid(x)) = min(x, 0) - log(1 + exp(-|x|)).
    return jnp.minimum(x, 0.0) - jnp.log(1.0 + jnp.exp(-jnp.abs(x)))


# ---------------------------------------------------------------------------
# Kernel: in-VMEM embedding gather (dynamic-slice rows) + vectorized SGNS loss
# ---------------------------------------------------------------------------
def _sgns_kernel(idx_ref,                 # SMEM (B*(2+K),) int32, flat: [x, y, neg_0..neg_{K-1}] per example
                 wi_ref, wo_ref,          # VMEM (V, E) f32 full tables
                 sign_ref, wgt_ref,       # VMEM (R, 1) f32 constants (R = TB*(1+K))
                 out_ref,                 # VMEM (1, 1) f32 per-tile partial loss
                 oth_buf, vi_buf,         # VMEM (R, E) f32 scratch
                 *, tile_b, neg_k, embed):
    TB, K, E = tile_b, neg_k, embed
    group = 1 + K                         # vO + K negatives per example
    i = pl.program_id(0)

    # ---- Gather: tables live in VMEM, pull rows with dynamic slices --------
    for t in range(TB):                   # unrolled; scratch offsets are static
        base = (i * TB + t) * (2 + K)     # flat SMEM offset for this example
        g0 = t * group
        xi = idx_ref[base + 0]
        yi = idx_ref[base + 1]
        vI = wi_ref[pl.ds(xi, 1), :]                                  # (1, E)
        vi_buf[pl.ds(g0, group), :] = jnp.broadcast_to(vI, (group, E))
        oth_buf[pl.ds(g0, 1), :] = wo_ref[pl.ds(yi, 1), :]            # vO row
        for k in range(K):
            ni = idx_ref[base + 2 + k]
            oth_buf[pl.ds(g0 + 1 + k, 1), :] = wo_ref[pl.ds(ni, 1), :]

    # ---- One vectorized multiply + lane reduce over the whole tile ---------
    # Row layout: row r belongs to example r // (1+K); row r is the positive
    # (vO) row iff r % (1+K) == 0, else a negative sample row.
    z = jnp.sum(oth_buf[...] * vi_buf[...], axis=1, keepdims=True)    # (R, 1)
    # pos rows: wgt = -1/B, sign = +1   -> -mean_b(pos_score)
    # neg rows: wgt = -1,   sign = -1   -> -sum_{b,k}(neg_score)
    contrib = wgt_ref[...] * _logsigmoid(sign_ref[...] * z)           # (R, 1)
    out_ref[...] = jnp.broadcast_to(jnp.sum(contrib), (1, 1))


def sgns_loss_pallas(WI, WO, x_idx, y_idx, neg_idx, *, max_tile_b=64):
    """WI, WO: (V, E) f32; x_idx, y_idx: (B,); neg_idx: (B, K) -> scalar loss."""
    B = x_idx.shape[0]
    K = neg_idx.shape[1]
    V, E = WI.shape

    # Largest batch tile <= max_tile_b that divides B.  (The gather loop is
    # unrolled at trace time, so keep the tile moderate.)
    tb = max(1, min(max_tile_b, B))
    while B % tb:
        tb -= 1
    num_tiles = B // tb
    group = 1 + K
    R = tb * group

    # Flattened, scalar-prefetched index table (1-D int32 in SMEM; avoids the
    # (B, 2+K) last-dim-padded-to-128 SMEM blow-up).
    idx = jnp.concatenate(
        [x_idx[:, None], y_idx[:, None], neg_idx],
        axis=1).astype(jnp.int32).reshape(-1)

    # Host-side constant sign / weight vectors for the group layout.
    rows = np.arange(R)
    is_pos = (rows % group) == 0
    sign = jnp.asarray(np.where(is_pos, 1.0, -1.0).reshape(R, 1), jnp.float32)
    wgt = jnp.asarray(np.where(is_pos, -1.0 / B, -1.0).reshape(R, 1), jnp.float32)

    kernel = functools.partial(_sgns_kernel, tile_b=tb, neg_k=K, embed=E)

    itm = 4  # f32 bytes
    vmem_need = (2 * (2 * V * E * itm)    # WI + WO (double-buffer worst case)
                 + 2 * (2 * R * itm)      # sign + wgt
                 + 2 * (R * E * itm)      # scratch buffers
                 + (2 << 20))             # headroom
    vmem_limit = int(min(max(vmem_need, 16 * 2**20), 32 * 2**20))

    grid_spec = pltpu.PrefetchScalarGridSpec(
        num_scalar_prefetch=1,
        grid=(num_tiles,),
        in_specs=[
            pl.BlockSpec((V, E), lambda i, idx_ref: (0, 0)),   # WI (full, VMEM)
            pl.BlockSpec((V, E), lambda i, idx_ref: (0, 0)),   # WO (full, VMEM)
            pl.BlockSpec((R, 1), lambda i, idx_ref: (0, 0)),   # sign
            pl.BlockSpec((R, 1), lambda i, idx_ref: (0, 0)),   # wgt
        ],
        out_specs=pl.BlockSpec((1, 1), lambda i, idx_ref: (i, 0)),
        scratch_shapes=[
            pltpu.VMEM((R, E), jnp.float32),   # gathered vO / negative rows
            pltpu.VMEM((R, E), jnp.float32),   # replicated vI rows
        ],
    )

    partials = pl.pallas_call(
        kernel,
        out_shape=jax.ShapeDtypeStruct((num_tiles, 1), jnp.float32),
        grid_spec=grid_spec,
        compiler_params=pltpu.CompilerParams(
            dimension_semantics=("parallel",),
            vmem_limit_bytes=vmem_limit),
    )(idx, WI, WO, sign, wgt)

    return jnp.sum(partials)


# ---------------------------------------------------------------------------
# Net.forward wrapper
# ---------------------------------------------------------------------------
def net_forward(params, word_image, x_idx, y_idx, neg_idx):
    # word_image is unused because the module sets calcVI = vI_out_early.
    # TODO(synk): the vI_out conv/fc gating branch (layer1/fc1/fc2/fc3/T/b and
    # alpha/beta) is never reached by forward(); not implemented here.
    del word_image
    return sgns_loss_pallas(params["WI"], params["WO"], x_idx, y_idx, neg_idx)


# Pure-JAX reference of the same math, for a correctness check.
def net_forward_ref(params, word_image, x_idx, y_idx, neg_idx):
    del word_image
    WI, WO = params["WI"], params["WO"]
    vI = WI[x_idx]
    vO = WO[y_idx]
    samples = WO[neg_idx]
    pos_score = jax.nn.log_sigmoid(jnp.sum(vO * vI, axis=1))
    neg_z = -jnp.einsum("bke,be->bk", samples, vI)
    neg_score = jax.nn.log_sigmoid(neg_z)
    loss_b = -pos_score - jnp.sum(neg_score)
    return jnp.mean(loss_b)


# ---------------------------------------------------------------------------
# Deterministic parameter / input construction
# ---------------------------------------------------------------------------
def init_params(key, vocab_size, embed_size):
    init_width = 0.5 / embed_size
    k1, k2 = jax.random.split(key)
    WI = jax.random.uniform(
        k1, (vocab_size, embed_size), jnp.float32, -init_width, init_width)
    WO = jax.random.uniform(
        k2, (vocab_size, embed_size), jnp.float32, -init_width, init_width)
    # alpha/beta/T/b/fc1/fc2/fc3/layer1 exist in __init__ but are unused in
    # forward() (vI_out_early path), so they are not materialized here.
    return {"WI": WI, "WO": WO}


if __name__ == "__main__":
    # Small shapes consistent with the module's forward.
    batch = 8
    embed_size = 32
    vocab_size = 64
    neg_samples = 5

    key = jax.random.PRNGKey(0)
    k_par, k_img, k_x, k_y, k_neg = jax.random.split(key, 5)

    params = init_params(k_par, vocab_size, embed_size)

    # word_image: NCHW (B, 1, 12, 48) like the PyTorch conv path expects
    # (unused by forward since calcVI = vI_out_early).
    word_image = jax.random.normal(k_img, (batch, 1, 12, 48), jnp.float32)
    x_idx = jax.random.randint(k_x, (batch,), 0, vocab_size)
    y_idx = jax.random.randint(k_y, (batch,), 0, vocab_size)
    # Deterministic stand-in for prepare_inputs' np.random negative sampling
    # (neg_dist taken as the identity index table).
    neg_idx = jax.random.randint(k_neg, (batch, neg_samples), 0, vocab_size)

    loss = jax.block_until_ready(
        net_forward(params, word_image, x_idx, y_idx, neg_idx))
    loss_ref = jax.block_until_ready(
        net_forward_ref(params, word_image, x_idx, y_idx, neg_idx))

    assert jnp.allclose(loss, loss_ref, rtol=1e-4, atol=1e-4), (loss, loss_ref)
    print("KERNEL_OK")
</pallas_src>

<mosaic_0001>
module attributes {stable_mosaic.version = 11 : i64} {
  func.func @_sgns_kernel(%arg0: i32, %arg1: memref<56xi32, #tpu.memory_space<smem>>, %arg2: memref<64x32xf32, #tpu.memory_space<vmem>>, %arg3: memref<64x32xf32, #tpu.memory_space<vmem>>, %arg4: memref<48x1xf32, #tpu.memory_space<vmem>>, %arg5: memref<48x1xf32, #tpu.memory_space<vmem>>, %arg6: memref<1x1xf32, #tpu.memory_space<vmem>>, %arg7: memref<48x32xf32, #tpu.memory_space<vmem>>, %arg8: memref<48x32xf32, #tpu.memory_space<vmem>>) attributes {dimension_semantics = [#tpu.dimension_semantics<parallel>], iteration_bounds = array<i64: 1>, scalar_prefetch = 1 : i64, scratch_operands = 2 : i64, tpu.core_type = #tpu.core_type<tc>, window_params = [{pipeline_mode = #tpu.pipeline_mode<synchronous>, transform_indices = @transform_0, window_bounds = array<i64: 64, 32>}, {pipeline_mode = #tpu.pipeline_mode<synchronous>, transform_indices = @transform_1, window_bounds = array<i64: 64, 32>}, {pipeline_mode = #tpu.pipeline_mode<synchronous>, transform_indices = @transform_2, window_bounds = array<i64: 48, 1>}, {pipeline_mode = #tpu.pipeline_mode<synchronous>, transform_indices = @transform_3, window_bounds = array<i64: 48, 1>}, {transform_indices = @transform_4, window_bounds = array<i64: 1, 1>}]} {
    %c8_i32 = arith.constant 8 : i32
    %0 = arith.muli %arg0, %c8_i32 : i32
    %c0_i32 = arith.constant 0 : i32
    %1 = arith.addi %0, %c0_i32 : i32
    %c7_i32 = arith.constant 7 : i32
    %2 = arith.muli %1, %c7_i32 : i32
    %c0_i32_0 = arith.constant 0 : i32
    %3 = arith.addi %2, %c0_i32_0 : i32
    %4 = arith.index_cast %3 : i32 to index
    %5 = memref.load %arg1[%4] : memref<56xi32, #tpu.memory_space<smem>>
    %c1_i32 = arith.constant 1 : i32
    %6 = arith.addi %2, %c1_i32 : i32
    %7 = arith.index_cast %6 : i32 to index
    %8 = memref.load %arg1[%7] : memref<56xi32, #tpu.memory_space<smem>>
    %9 = arith.index_cast %5 : i32 to index
    %c0 = arith.constant 0 : index
    %10 = vector.load %arg2[%9, %c0] : memref<64x32xf32, #tpu.memory_space<vmem>>, vector<1x32xf32>
    %11 = vector.shape_cast %10 : vector<1x32xf32> to vector<1x32xf32>
    %12 = vector.broadcast %11 : vector<1x32xf32> to vector<6x32xf32>
    %c0_1 = arith.constant 0 : index
    %c0_2 = arith.constant 0 : index
    %13 = vector.load %arg8[%c0_1, %c0_2] : memref<48x32xf32, #tpu.memory_space<vmem>>, vector<6x32xf32>
    tpu.vector_store %arg8[%c0_1, %c0_2], %12 {strides = array<i32>} : memref<48x32xf32, #tpu.memory_space<vmem>>, vector<6x32xf32>,
    %14 = arith.index_cast %8 : i32 to index
    %c0_3 = arith.constant 0 : index
    %15 = vector.load %arg3[%14, %c0_3] : memref<64x32xf32, #tpu.memory_space<vmem>>, vector<1x32xf32>
    %c0_4 = arith.constant 0 : index
    %c0_5 = arith.constant 0 : index
    %16 = vector.load %arg7[%c0_4, %c0_5] : memref<48x32xf32, #tpu.memory_space<vmem>>, vector<1x32xf32>
    tpu.vector_store %arg7[%c0_4, %c0_5], %15 {strides = array<i32>} : memref<48x32xf32, #tpu.memory_space<vmem>>, vector<1x32xf32>,
    %c2_i32 = arith.constant 2 : i32
    %17 = arith.addi %2, %c2_i32 : i32
    %c0_i32_6 = arith.constant 0 : i32
    %18 = arith.addi %17, %c0_i32_6 : i32
    %19 = arith.index_cast %18 : i32 to index
    %20 = memref.load %arg1[%19] : memref<56xi32, #tpu.memory_space<smem>>
    %21 = arith.index_cast %20 : i32 to index
    %c0_7 = arith.constant 0 : index
    %22 = vector.load %arg3[%21, %c0_7] : memref<64x32xf32, #tpu.memory_space<vmem>>, vector<1x32xf32>
    %c1 = arith.constant 1 : index
    %c0_8 = arith.constant 0 : index
    %23 = vector.load %arg7[%c1, %c0_8] : memref<48x32xf32, #tpu.memory_space<vmem>>, vector<1x32xf32>
    tpu.vector_store %arg7[%c1, %c0_8], %22 {strides = array<i32>} : memref<48x32xf32, #tpu.memory_space<vmem>>, vector<1x32xf32>,
    %c2_i32_9 = arith.constant 2 : i32
    %24 = arith.addi %2, %c2_i32_9 : i32
    %c1_i32_10 = arith.constant 1 : i32
    %25 = arith.addi %24, %c1_i32_10 : i32
    %26 = arith.index_cast %25 : i32 to index
    %27 = memref.load %arg1[%26] : memref<56xi32, #tpu.memory_space<smem>>
    %28 = arith.index_cast %27 : i32 to index
    %c0_11 = arith.constant 0 : index
    %29 = vector.load %arg3[%28, %c0_11] : memref<64x32xf32, #tpu.memory_space<vmem>>, vector<1x32xf32>
    %c2 = arith.constant 2 : index
    %c0_12 = arith.constant 0 : index
    %30 = vector.load %arg7[%c2, %c0_12] : memref<48x32xf32, #tpu.memory_space<vmem>>, vector<1x32xf32>
    tpu.vector_store %arg7[%c2, %c0_12], %29 {strides = array<i32>} : memref<48x32xf32, #tpu.memory_space<vmem>>, vector<1x32xf32>,
    %c2_i32_13 = arith.constant 2 : i32
    %31 = arith.addi %2, %c2_i32_13 : i32
    %c2_i32_14 = arith.constant 2 : i32
    %32 = arith.addi %31, %c2_i32_14 : i32
    %33 = arith.index_cast %32 : i32 to index
    %34 = memref.load %arg1[%33] : memref<56xi32, #tpu.memory_space<smem>>
    %35 = arith.index_cast %34 : i32 to index
    %c0_15 = arith.constant 0 : index
    %36 = vector.load %arg3[%35, %c0_15] : memref<64x32xf32, #tpu.memory_space<vmem>>, vector<1x32xf32>
    %c3 = arith.constant 3 : index
    %c0_16 = arith.constant 0 : index
    %37 = vector.load %arg7[%c3, %c0_16] : memref<48x32xf32, #tpu.memory_space<vmem>>, vector<1x32xf32>
    tpu.vector_store %arg7[%c3, %c0_16], %36 {strides = array<i32>} : memref<48x32xf32, #tpu.memory_space<vmem>>, vector<1x32xf32>,
    %c2_i32_17 = arith.constant 2 : i32
    %38 = arith.addi %2, %c2_i32_17 : i32
    %c3_i32 = arith.constant 3 : i32
    %39 = arith.addi %38, %c3_i32 : i32
    %40 = arith.index_cast %39 : i32 to index
    %41 = memref.load %arg1[%40] : memref<56xi32, #tpu.memory_space<smem>>
    %42 = arith.index_cast %41 : i32 to index
    %c0_18 = arith.constant 0 : index
    %43 = vector.load %arg3[%42, %c0_18] : memref<64x32xf32, #tpu.memory_space<vmem>>, vector<1x32xf32>
    %c4 = arith.constant 4 : index
    %c0_19 = arith.constant 0 : index
    %44 = vector.load %arg7[%c4, %c0_19] : memref<48x32xf32, #tpu.memory_space<vmem>>, vector<1x32xf32>
    tpu.vector_store %arg7[%c4, %c0_19], %43 {strides = array<i32>} : memref<48x32xf32, #tpu.memory_space<vmem>>, vector<1x32xf32>,
    %c2_i32_20 = arith.constant 2 : i32
    %45 = arith.addi %2, %c2_i32_20 : i32
    %c4_i32 = arith.constant 4 : i32
    %46 = arith.addi %45, %c4_i32 : i32
    %47 = arith.index_cast %46 : i32 to index
    %48 = memref.load %arg1[%47] : memref<56xi32, #tpu.memory_space<smem>>
    %49 = arith.index_cast %48 : i32 to index
    %c0_21 = arith.constant 0 : index
    %50 = vector.load %arg3[%49, %c0_21] : memref<64x32xf32, #tpu.memory_space<vmem>>, vector<1x32xf32>
    %c5 = arith.constant 5 : index
    %c0_22 = arith.constant 0 : index
    %51 = vector.load %arg7[%c5, %c0_22] : memref<48x32xf32, #tpu.memory_space<vmem>>, vector<1x32xf32>
    tpu.vector_store %arg7[%c5, %c0_22], %50 {strides = array<i32>} : memref<48x32xf32, #tpu.memory_space<vmem>>, vector<1x32xf32>,
    %c8_i32_23 = arith.constant 8 : i32
    %52 = arith.muli %arg0, %c8_i32_23 : i32
    %c1_i32_24 = arith.constant 1 : i32
    %53 = arith.addi %52, %c1_i32_24 : i32
    %c7_i32_25 = arith.constant 7 : i32
    %54 = arith.muli %53, %c7_i32_25 : i32
    %c0_i32_26 = arith.constant 0 : i32
    %55 = arith.addi %54, %c0_i32_26 : i32
    %56 = arith.index_cast %55 : i32 to index
    %57 = memref.load %arg1[%56] : memref<56xi32, #tpu.memory_space<smem>>
    %c1_i32_27 = arith.constant 1 : i32
    %58 = arith.addi %54, %c1_i32_27 : i32
    %59 = arith.index_cast %58 : i32 to index
    %60 = memref.load %arg1[%59] : memref<56xi32, #tpu.memory_space<smem>>
    %61 = arith.index_cast %57 : i32 to index
    %c0_28 = arith.constant 0 : index
    %62 = vector.load %arg2[%61, %c0_28] : memref<64x32xf32, #tpu.memory_space<vmem>>, vector<1x32xf32>
    %63 = vector.shape_cast %62 : vector<1x32xf32> to vector<1x32xf32>
    %64 = vector.broadcast %63 : vector<1x32xf32> to vector<6x32xf32>
    %c6 = arith.constant 6 : index
    %c0_29 = arith.constant 0 : index
    %65 = vector.load %arg8[%c6, %c0_29] : memref<48x32xf32, #tpu.memory_space<vmem>>, vector<6x32xf32>
    tpu.vector_store %arg8[%c6, %c0_29], %64 {strides = array<i32>} : memref<48x32xf32, #tpu.memory_space<vmem>>, vector<6x32xf32>,
    %66 = arith.index_cast %60 : i32 to index
    %c0_30 = arith.constant 0 : index
    %67 = vector.load %arg3[%66, %c0_30] : memref<64x32xf32, #tpu.memory_space<vmem>>, vector<1x32xf32>
    %c6_31 = arith.constant 6 : index
    %c0_32 = arith.constant 0 : index
    %68 = vector.load %arg7[%c6_31, %c0_32] : memref<48x32xf32, #tpu.memory_space<vmem>>, vector<1x32xf32>
    tpu.vector_store %arg7[%c6_31, %c0_32], %67 {strides = array<i32>} : memref<48x32xf32, #tpu.memory_space<vmem>>, vector<1x32xf32>,
    %c2_i32_33 = arith.constant 2 : i32
    %69 = arith.addi %54, %c2_i32_33 : i32
    %c0_i32_34 = arith.constant 0 : i32
    %70 = arith.addi %69, %c0_i32_34 : i32
    %71 = arith.index_cast %70 : i32 to index
    %72 = memref.load %arg1[%71] : memref<56xi32, #tpu.memory_space<smem>>
    %73 = arith.index_cast %72 : i32 to index
    %c0_35 = arith.constant 0 : index
    %74 = vector.load %arg3[%73, %c0_35] : memref<64x32xf32, #tpu.memory_space<vmem>>, vector<1x32xf32>
    %c7 = arith.constant 7 : index
    %c0_36 = arith.constant 0 : index
    %75 = vector.load %arg7[%c7, %c0_36] : memref<48x32xf32, #tpu.memory_space<vmem>>, vector<1x32xf32>
    tpu.vector_store %arg7[%c7, %c0_36], %74 {strides = array<i32>} : memref<48x32xf32, #tpu.memory_space<vmem>>, vector<1x32xf32>,
    %c2_i32_37 = arith.constant 2 : i32
    %76 = arith.addi %54, %c2_i32_37 : i32
    %c1_i32_38 = arith.constant 1 : i32
    %77 = arith.addi %76, %c1_i32_38 : i32
    %78 = arith.index_cast %77 : i32 to index
    %79 = memref.load %arg1[%78] : memref<56xi32, #tpu.memory_space<smem>>
    %80 = arith.index_cast %79 : i32 to index
    %c0_39 = arith.constant 0 : index
    %81 = vector.load %arg3[%80, %c0_39] : memref<64x32xf32, #tpu.memory_space<vmem>>, vector<1x32xf32>
    %c8 = arith.constant 8 : index
    %c0_40 = arith.constant 0 : index
    %82 = vector.load %arg7[%c8, %c0_40] : memref<48x32xf32, #tpu.memory_space<vmem>>, vector<1x32xf32>
    tpu.vector_store %arg7[%c8, %c0_40], %81 {strides = array<i32>} : memref<48x32xf32, #tpu.memory_space<vmem>>, vector<1x32xf32>,
    %c2_i32_41 = arith.constant 2 : i32
    %83 = arith.addi %54, %c2_i32_41 : i32
    %c2_i32_42 = arith.constant 2 : i32
    %84 = arith.addi %83, %c2_i32_42 : i32
    %85 = arith.index_cast %84 : i32 to index
    %86 = memref.load %arg1[%85] : memref<56xi32, #tpu.memory_space<smem>>
    %87 = arith.index_cast %86 : i32 to index
    %c0_43 = arith.constant 0 : index
    %88 = vector.load %arg3[%87, %c0_43] : memref<64x32xf32, #tpu.memory_space<vmem>>, vector<1x32xf32>
    %c9 = arith.constant 9 : index
    %c0_44 = arith.constant 0 : index
    %89 = vector.load %arg7[%c9, %c0_44] : memref<48x32xf32, #tpu.memory_space<vmem>>, vector<1x32xf32>
    tpu.vector_store %arg7[%c9, %c0_44], %88 {strides = array<i32>} : memref<48x32xf32, #tpu.memory_space<vmem>>, vector<1x32xf32>,
    %c2_i32_45 = arith.constant 2 : i32
    %90 = arith.addi %54, %c2_i32_45 : i32
    %c3_i32_46 = arith.constant 3 : i32
    %91 = arith.addi %90, %c3_i32_46 : i32
    %92 = arith.index_cast %91 : i32 to index
    %93 = memref.load %arg1[%92] : memref<56xi32, #tpu.memory_space<smem>>
    %94 = arith.index_cast %93 : i32 to index
    %c0_47 = arith.constant 0 : index
    %95 = vector.load %arg3[%94, %c0_47] : memref<64x32xf32, #tpu.memory_space<vmem>>, vector<1x32xf32>
    %c10 = arith.constant 10 : index
    %c0_48 = arith.constant 0 : index
    %96 = vector.load %arg7[%c10, %c0_48] : memref<48x32xf32, #tpu.memory_space<vmem>>, vector<1x32xf32>
    tpu.vector_store %arg7[%c10, %c0_48], %95 {strides = array<i32>} : memref<48x32xf32, #tpu.memory_space<vmem>>, vector<1x32xf32>,
    %c2_i32_49 = arith.constant 2 : i32
    %97 = arith.addi %54, %c2_i32_49 : i32
    %c4_i32_50 = arith.constant 4 : i32
    %98 = arith.addi %97, %c4_i32_50 : i32
    %99 = arith.index_cast %98 : i32 to index
    %100 = memref.load %arg1[%99] : memref<56xi32, #tpu.memory_space<smem>>
    %101 = arith.index_cast %100 : i32 to index
    %c0_51 = arith.constant 0 : index
    %102 = vector.load %arg3[%101, %c0_51] : memref<64x32xf32, #tpu.memory_space<vmem>>, vector<1x32xf32>
    %c11 = arith.constant 11 : index
    %c0_52 = arith.constant 0 : index
    %103 = vector.load %arg7[%c11, %c0_52] : memref<48x32xf32, #tpu.memory_space<vmem>>, vector<1x32xf32>
    tpu.vector_store %arg7[%c11, %c0_52], %102 {strides = array<i32>} : memref<48x32xf32, #tpu.memory_space<vmem>>, vector<1x32xf32>,
    %c8_i32_53 = arith.constant 8 : i32
    %104 = arith.muli %arg0, %c8_i32_53 : i32
    %c2_i32_54 = arith.constant 2 : i32
    %105 = arith.addi %104, %c2_i32_54 : i32
    %c7_i32_55 = arith.constant 7 : i32
    %106 = arith.muli %105, %c7_i32_55 : i32
    %c0_i32_56 = arith.constant 0 : i32
    %107 = arith.addi %106, %c0_i32_56 : i32
    %108 = arith.index_cast %107 : i32 to index
    %109 = memref.load %arg1[%108] : memref<56xi32, #tpu.memory_space<smem>>
    %c1_i32_57 = arith.constant 1 : i32
    %110 = arith.addi %106, %c1_i32_57 : i32
    %111 = arith.index_cast %110 : i32 to index
    %112 = memref.load %arg1[%111] : memref<56xi32, #tpu.memory_space<smem>>
    %113 = arith.index_cast %109 : i32 to index
    %c0_58 = arith.constant 0 : index
    %114 = vector.load %arg2[%113, %c0_58] : memref<64x32xf32, #tpu.memory_space<vmem>>, vector<1x32xf32>
    %115 = vector.shape_cast %114 : vector<1x32xf32> to vector<1x32xf32>
    %116 = vector.broadcast %115 : vector<1x32xf32> to vector<6x32xf32>
    %c12 = arith.constant 12 : index
    %c0_59 = arith.constant 0 : index
    %117 = vector.load %arg8[%c12, %c0_59] : memref<48x32xf32, #tpu.memory_space<vmem>>, vector<6x32xf32>
    tpu.vector_store %arg8[%c12, %c0_59], %116 {strides = array<i32>} : memref<48x32xf32, #tpu.memory_space<vmem>>, vector<6x32xf32>,
    %118 = arith.index_cast %112 : i32 to index
    %c0_60 = arith.constant 0 : index
    %119 = vector.load %arg3[%118, %c0_60] : memref<64x32xf32, #tpu.memory_space<vmem>>, vector<1x32xf32>
    %c12_61 = arith.constant 12 : index
    %c0_62 = arith.constant 0 : index
    %120 = vector.load %arg7[%c12_61, %c0_62] : memref<48x32xf32, #tpu.memory_space<vmem>>, vector<1x32xf32>
    tpu.vector_store %arg7[%c12_61, %c0_62], %119 {strides = array<i32>} : memref<48x32xf32, #tpu.memory_space<vmem>>, vector<1x32xf32>,
    %c2_i32_63 = arith.constant 2 : i32
    %121 = arith.addi %106, %c2_i32_63 : i32
    %c0_i32_64 = arith.constant 0 : i32
    %122 = arith.addi %121, %c0_i32_64 : i32
    %123 = arith.index_cast %122 : i32 to index
    %124 = memref.load %arg1[%123] : memref<56xi32, #tpu.memory_space<smem>>
    %125 = arith.index_cast %124 : i32 to index
    %c0_65 = arith.constant 0 : index
    %126 = vector.load %arg3[%125, %c0_65] : memref<64x32xf32, #tpu.memory_space<vmem>>, vector<1x32xf32>
    %c13 = arith.constant 13 : index
    %c0_66 = arith.constant 0 : index
    %127 = vector.load %arg7[%c13, %c0_66] : memref<48x32xf32, #tpu.memory_space<vmem>>, vector<1x32xf32>
    tpu.vector_store %arg7[%c13, %c0_66], %126 {strides = array<i32>} : memref<48x32xf32, #tpu.memory_space<vmem>>, vector<1x32xf32>,
    %c2_i32_67 = arith.constant 2 : i32
    %128 = arith.addi %106, %c2_i32_67 : i32
    %c1_i32_68 = arith.constant 1 : i32
    %129 = arith.addi %128, %c1_i32_68 : i32
    %130 = arith.index_cast %129 : i32 to index
    %131 = memref.load %arg1[%130] : memref<56xi32, #tpu.memory_space<smem>>
    %132 = arith.index_cast %131 : i32 to index
    %c0_69 = arith.constant 0 : index
    %133 = vector.load %arg3[%132, %c0_69] : memref<64x32xf32, #tpu.memory_space<vmem>>, vector<1x32xf32>
    %c14 = arith.constant 14 : index
    %c0_70 = arith.constant 0 : index
    %134 = vector.load %arg7[%c14, %c0_70] : memref<48x32xf32, #tpu.memory_space<vmem>>, vector<1x32xf32>
    tpu.vector_store %arg7[%c14, %c0_70], %133 {strides = array<i32>} : memref<48x32xf32, #tpu.memory_space<vmem>>, vector<1x32xf32>,
    %c2_i32_71 = arith.constant 2 : i32
    %135 = arith.addi %106, %c2_i32_71 : i32
    %c2_i32_72 = arith.constant 2 : i32
    %136 = arith.addi %135, %c2_i32_72 : i32
    %137 = arith.index_cast %136 : i32 to index
    %138 = memref.load %arg1[%137] : memref<56xi32, #tpu.memory_space<smem>>
    %139 = arith.index_cast %138 : i32 to index
    %c0_73 = arith.constant 0 : index
    %140 = vector.load %arg3[%139, %c0_73] : memref<64x32xf32, #tpu.memory_space<vmem>>, vector<1x32xf32>
    %c15 = arith.constant 15 : index
    %c0_74 = arith.constant 0 : index
    %141 = vector.load %arg7[%c15, %c0_74] : memref<48x32xf32, #tpu.memory_space<vmem>>, vector<1x32xf32>
    tpu.vector_store %arg7[%c15, %c0_74], %140 {strides = array<i32>} : memref<48x32xf32, #tpu.memory_space<vmem>>, vector<1x32xf32>,
    %c2_i32_75 = arith.constant 2 : i32
    %142 = arith.addi %106, %c2_i32_75 : i32
    %c3_i32_76 = arith.constant 3 : i32
    %143 = arith.addi %142, %c3_i32_76 : i32
    %144 = arith.index_cast %143 : i32 to index
    %145 = memref.load %arg1[%144] : memref<56xi32, #tpu.memory_space<smem>>
    %146 = arith.index_cast %145 : i32 to index
    %c0_77 = arith.constant 0 : index
    %147 = vector.load %arg3[%146, %c0_77] : memref<64x32xf32, #tpu.memory_space<vmem>>, vector<1x32xf32>
    %c16 = arith.constant 16 : index
    %c0_78 = arith.constant 0 : index
    %148 = vector.load %arg7[%c16, %c0_78] : memref<48x32xf32, #tpu.memory_space<vmem>>, vector<1x32xf32>
    tpu.vector_store %arg7[%c16, %c0_78], %147 {strides = array<i32>} : memref<48x32xf32, #tpu.memory_space<vmem>>, vector<1x32xf32>,
    %c2_i32_79 = arith.constant 2 : i32
    %149 = arith.addi %106, %c2_i32_79 : i32
    %c4_i32_80 = arith.constant 4 : i32
    %150 = arith.addi %149, %c4_i32_80 : i32
    %151 = arith.index_cast %150 : i32 to index
    %152 = memref.load %arg1[%151] : memref<56xi32, #tpu.memory_space<smem>>
    %153 = arith.index_cast %152 : i32 to index
    %c0_81 = arith.constant 0 : index
    %154 = vector.load %arg3[%153, %c0_81] : memref<64x32xf32, #tpu.memory_space<vmem>>, vector<1x32xf32>
    %c17 = arith.constant 17 : index
    %c0_82 = arith.constant 0 : index
    %155 = vector.load %arg7[%c17, %c0_82] : memref<48x32xf32, #tpu.memory_space<vmem>>, vector<1x32xf32>
    tpu.vector_store %arg7[%c17, %c0_82], %154 {strides = array<i32>} : memref<48x32xf32, #tpu.memory_space<vmem>>, vector<1x32xf32>,
    %c8_i32_83 = arith.constant 8 : i32
    %156 = arith.muli %arg0, %c8_i32_83 : i32
    %c3_i32_84 = arith.constant 3 : i32
    %157 = arith.addi %156, %c3_i32_84 : i32
    %c7_i32_85 = arith.constant 7 : i32
    %158 = arith.muli %157, %c7_i32_85 : i32
    %c0_i32_86 = arith.constant 0 : i32
    %159 = arith.addi %158, %c0_i32_86 : i32
    %160 = arith.index_cast %159 : i32 to index
    %161 = memref.load %arg1[%160] : memref<56xi32, #tpu.memory_space<smem>>
    %c1_i32_87 = arith.constant 1 : i32
    %162 = arith.addi %158, %c1_i32_87 : i32
    %163 = arith.index_cast %162 : i32 to index
    %164 = memref.load %arg1[%163] : memref<56xi32, #tpu.memory_space<smem>>
    %165 = arith.index_cast %161 : i32 to index
    %c0_88 = arith.constant 0 : index
    %166 = vector.load %arg2[%165, %c0_88] : memref<64x32xf32, #tpu.memory_space<vmem>>, vector<1x32xf32>
    %167 = vector.shape_cast %166 : vector<1x32xf32> to vector<1x32xf32>
    %168 = vector.broadcast %167 : vector<1x32xf32> to vector<6x32xf32>
    %c18 = arith.constant 18 : index
    %c0_89 = arith.constant 0 : index
    %169 = vector.load %arg8[%c18, %c0_89] : memref<48x32xf32, #tpu.memory_space<vmem>>, vector<6x32xf32>
    tpu.vector_store %arg8[%c18, %c0_89], %168 {strides = array<i32>} : memref<48x32xf32, #tpu.memory_space<vmem>>, vector<6x32xf32>,
    %170 = arith.index_cast %164 : i32 to index
    %c0_90 = arith.constant 0 : index
    %171 = vector.load %arg3[%170, %c0_90] : memref<64x32xf32, #tpu.memory_space<vmem>>, vector<1x32xf32>
    %c18_91 = arith.constant 18 : index
    %c0_92 = arith.constant 0 : index
    %172 = vector.load %arg7[%c18_91, %c0_92] : memref<48x32xf32, #tpu.memory_space<vmem>>, vector<1x32xf32>
    tpu.vector_store %arg7[%c18_91, %c0_92], %171 {strides = array<i32>} : memref<48x32xf32, #tpu.memory_space<vmem>>, vector<1x32xf32>,
    %c2_i32_93 = arith.constant 2 : i32
    %173 = arith.addi %158, %c2_i32_93 : i32
    %c0_i32_94 = arith.constant 0 : i32
    %174 = arith.addi %173, %c0_i32_94 : i32
    %175 = arith.index_cast %174 : i32 to index
    %176 = memref.load %arg1[%175] : memref<56xi32, #tpu.memory_space<smem>>
    %177 = arith.index_cast %176 : i32 to index
    %c0_95 = arith.constant 0 : index
    %178 = vector.load %arg3[%177, %c0_95] : memref<64x32xf32, #tpu.memory_space<vmem>>, vector<1x32xf32>
    %c19 = arith.constant 19 : index
    %c0_96 = arith.constant 0 : index
    %179 = vector.load %arg7[%c19, %c0_96] : memref<48x32xf32, #tpu.memory_space<vmem>>, vector<1x32xf32>
    tpu.vector_store %arg7[%c19, %c0_96], %178 {strides = array<i32>} : memref<48x32xf32, #tpu.memory_space<vmem>>, vector<1x32xf32>,
    %c2_i32_97 = arith.constant 2 : i32
    %180 = arith.addi %158, %c2_i32_97 : i32
    %c1_i32_98 = arith.constant 1 : i32
    %181 = arith.addi %180, %c1_i32_98 : i32
    %182 = arith.index_cast %181 : i32 to index
    %183 = memref.load %arg1[%182] : memref<56xi32, #tpu.memory_space<smem>>
    %184 = arith.index_cast %183 : i32 to index
    %c0_99 = arith.constant 0 : index
    %185 = vector.load %arg3[%184, %c0_99] : memref<64x32xf32, #tpu.memory_space<vmem>>, vector<1x32xf32>
    %c20 = arith.constant 20 : index
    %c0_100 = arith.constant 0 : index
    %186 = vector.load %arg7[%c20, %c0_100] : memref<48x32xf32, #tpu.memory_space<vmem>>, vector<1x32xf32>
    tpu.vector_store %arg7[%c20, %c0_100], %185 {strides = array<i32>} : memref<48x32xf32, #tpu.memory_space<vmem>>, vector<1x32xf32>,
    %c2_i32_101 = arith.constant 2 : i32
    %187 = arith.addi %158, %c2_i32_101 : i32
    %c2_i32_102 = arith.constant 2 : i32
    %188 = arith.addi %187, %c2_i32_102 : i32
    %189 = arith.index_cast %188 : i32 to index
    %190 = memref.load %arg1[%189] : memref<56xi32, #tpu.memory_space<smem>>
    %191 = arith.index_cast %190 : i32 to index
    %c0_103 = arith.constant 0 : index
    %192 = vector.load %arg3[%191, %c0_103] : memref<64x32xf32, #tpu.memory_space<vmem>>, vector<1x32xf32>
    %c21 = arith.constant 21 : index
    %c0_104 = arith.constant 0 : index
    %193 = vector.load %arg7[%c21, %c0_104] : memref<48x32xf32, #tpu.memory_space<vmem>>, vector<1x32xf32>
    tpu.vector_store %arg7[%c21, %c0_104], %192 {strides = array<i32>} : memref<48x32xf32, #tpu.memory_space<vmem>>, vector<1x32xf32>,
    %c2_i32_105 = arith.constant 2 : i32
    %194 = arith.addi %158, %c2_i32_105 : i32
    %c3_i32_106 = arith.constant 3 : i32
    %195 = arith.addi %194, %c3_i32_106 : i32
    %196 = arith.index_cast %195 : i32 to index
    %197 = memref.load %arg1[%196] : memref<56xi32, #tpu.memory_space<smem>>
    %198 = arith.index_cast %197 : i32 to index
    %c0_107 = arith.constant 0 : index
    %199 = vector.load %arg3[%198, %c0_107] : memref<64x32xf32, #tpu.memory_space<vmem>>, vector<1x32xf32>
    %c22 = arith.constant 22 : index
    %c0_108 = arith.constant 0 : index
    %200 = vector.load %arg7[%c22, %c0_108] : memref<48x32xf32, #tpu.memory_space<vmem>>, vector<1x32xf32>
    tpu.vector_store %arg7[%c22, %c0_108], %199 {strides = array<i32>} : memref<48x32xf32, #tpu.memory_space<vmem>>, vector<1x32xf32>,
    %c2_i32_109 = arith.constant 2 : i32
    %201 = arith.addi %158, %c2_i32_109 : i32
    %c4_i32_110 = arith.constant 4 : i32
    %202 = arith.addi %201, %c4_i32_110 : i32
    %203 = arith.index_cast %202 : i32 to index
    %204 = memref.load %arg1[%203] : memref<56xi32, #tpu.memory_space<smem>>
    %205 = arith.index_cast %204 : i32 to index
    %c0_111 = arith.constant 0 : index
    %206 = vector.load %arg3[%205, %c0_111] : memref<64x32xf32, #tpu.memory_space<vmem>>, vector<1x32xf32>
    %c23 = arith.constant 23 : index
    %c0_112 = arith.constant 0 : index
    %207 = vector.load %arg7[%c23, %c0_112] : memref<48x32xf32, #tpu.memory_space<vmem>>, vector<1x32xf32>
    tpu.vector_store %arg7[%c23, %c0_112], %206 {strides = array<i32>} : memref<48x32xf32, #tpu.memory_space<vmem>>, vector<1x32xf32>,
    %c8_i32_113 = arith.constant 8 : i32
    %208 = arith.muli %arg0, %c8_i32_113 : i32
    %c4_i32_114 = arith.constant 4 : i32
    %209 = arith.addi %208, %c4_i32_114 : i32
    %c7_i32_115 = arith.constant 7 : i32
    %210 = arith.muli %209, %c7_i32_115 : i32
    %c0_i32_116 = arith.constant 0 : i32
    %211 = arith.addi %210, %c0_i32_116 : i32
    %212 = arith.index_cast %211 : i32 to index
    %213 = memref.load %arg1[%212] : memref<56xi32, #tpu.memory_space<smem>>
    %c1_i32_117 = arith.constant 1 : i32
    %214 = arith.addi %210, %c1_i32_117 : i32
    %215 = arith.index_cast %214 : i32 to index
    %216 = memref.load %arg1[%215] : memref<56xi32, #tpu.memory_space<smem>>
    %217 = arith.index_cast %213 : i32 to index
    %c0_118 = arith.constant 0 : index
    %218 = vector.load %arg2[%217, %c0_118] : memref<64x32xf32, #tpu.memory_space<vmem>>, vector<1x32xf32>
    %219 = vector.shape_cast %218 : vector<1x32xf32> to vector<1x32xf32>
    %220 = vector.broadcast %219 : vector<1x32xf32> to vector<6x32xf32>
    %c24 = arith.constant 24 : index
    %c0_119 = arith.constant 0 : index
    %221 = vector.load %arg8[%c24, %c0_119] : memref<48x32xf32, #tpu.memory_space<vmem>>, vector<6x32xf32>
    tpu.vector_store %arg8[%c24, %c0_119], %220 {strides = array<i32>} : memref<48x32xf32, #tpu.memory_space<vmem>>, vector<6x32xf32>,
    %222 = arith.index_cast %216 : i32 to index
    %c0_120 = arith.constant 0 : index
    %223 = vector.load %arg3[%222, %c0_120] : memref<64x32xf32, #tpu.memory_space<vmem>>, vector<1x32xf32>
    %c24_121 = arith.constant 24 : index
    %c0_122 = arith.constant 0 : index
    %224 = vector.load %arg7[%c24_121, %c0_122] : memref<48x32xf32, #tpu.memory_space<vmem>>, vector<1x32xf32>
    tpu.vector_store %arg7[%c24_121, %c0_122], %223 {strides = array<i32>} : memref<48x32xf32, #tpu.memory_space<vmem>>, vector<1x32xf32>,
    %c2_i32_123 = arith.constant 2 : i32
    %225 = arith.addi %210, %c2_i32_123 : i32
    %c0_i32_124 = arith.constant 0 : i32
    %226 = arith.addi %225, %c0_i32_124 : i32
    %227 = arith.index_cast %226 : i32 to index
    %228 = memref.load %arg1[%227] : memref<56xi32, #tpu.memory_space<smem>>
    %229 = arith.index_cast %228 : i32 to index
    %c0_125 = arith.constant 0 : index
    %230 = vector.load %arg3[%229, %c0_125] : memref<64x32xf32, #tpu.memory_space<vmem>>, vector<1x32xf32>
    %c25 = arith.constant 25 : index
    %c0_126 = arith.constant 0 : index
    %231 = vector.load %arg7[%c25, %c0_126] : memref<48x32xf32, #tpu.memory_space<vmem>>, vector<1x32xf32>
    tpu.vector_store %arg7[%c25, %c0_126], %230 {strides = array<i32>} : memref<48x32xf32, #tpu.memory_space<vmem>>, vector<1x32xf32>,
    %c2_i32_127 = arith.constant 2 : i32
    %232 = arith.addi %210, %c2_i32_127 : i32
    %c1_i32_128 = arith.constant 1 : i32
    %233 = arith.addi %232, %c1_i32_128 : i32
    %234 = arith.index_cast %233 : i32 to index
    %235 = memref.load %arg1[%234] : memref<56xi32, #tpu.memory_space<smem>>
    %236 = arith.index_cast %235 : i32 to index
    %c0_129 = arith.constant 0 : index
    %237 = vector.load %arg3[%236, %c0_129] : memref<64x32xf32, #tpu.memory_space<vmem>>, vector<1x32xf32>
    %c26 = arith.constant 26 : index
    %c0_130 = arith.constant 0 : index
    %238 = vector.load %arg7[%c26, %c0_130] : memref<48x32xf32, #tpu.memory_space<vmem>>, vector<1x32xf32>
    tpu.vector_store %arg7[%c26, %c0_130], %237 {strides = array<i32>} : memref<48x32xf32, #tpu.memory_space<vmem>>, vector<1x32xf32>,
    %c2_i32_131 = arith.constant 2 : i32
    %239 = arith.addi %210, %c2_i32_131 : i32
    %c2_i32_132 = arith.constant 2 : i32
    %240 = arith.addi %239, %c2_i32_132 : i32
    %241 = arith.index_cast %240 : i32 to index
    %242 = memref.load %arg1[%241] : memref<56xi32, #tpu.memory_space<smem>>
    %243 = arith.index_cast %242 : i32 to index
    %c0_133 = arith.constant 0 : index
    %244 = vector.load %arg3[%243, %c0_133] : memref<64x32xf32, #tpu.memory_space<vmem>>, vector<1x32xf32>
    %c27 = arith.constant 27 : index
    %c0_134 = arith.constant 0 : index
    %245 = vector.load %arg7[%c27, %c0_134] : memref<48x32xf32, #tpu.memory_space<vmem>>, vector<1x32xf32>
    tpu.vector_store %arg7[%c27, %c0_134], %244 {strides = array<i32>} : memref<48x32xf32, #tpu.memory_space<vmem>>, vector<1x32xf32>,
    %c2_i32_135 = arith.constant 2 : i32
    %246 = arith.addi %210, %c2_i32_135 : i32
    %c3_i32_136 = arith.constant 3 : i32
    %247 = arith.addi %246, %c3_i32_136 : i32
    %248 = arith.index_cast %247 : i32 to index
    %249 = memref.load %arg1[%248] : memref<56xi32, #tpu.memory_space<smem>>
    %250 = arith.index_cast %249 : i32 to index
    %c0_137 = arith.constant 0 : index
    %251 = vector.load %arg3[%250, %c0_137] : memref<64x32xf32, #tpu.memory_space<vmem>>, vector<1x32xf32>
    %c28 = arith.constant 28 : index
    %c0_138 = arith.constant 0 : index
    %252 = vector.load %arg7[%c28, %c0_138] : memref<48x32xf32, #tpu.memory_space<vmem>>, vector<1x32xf32>
    tpu.vector_store %arg7[%c28, %c0_138], %251 {strides = array<i32>} : memref<48x32xf32, #tpu.memory_space<vmem>>, vector<1x32xf32>,
    %c2_i32_139 = arith.constant 2 : i32
    %253 = arith.addi %210, %c2_i32_139 : i32
    %c4_i32_140 = arith.constant 4 : i32
    %254 = arith.addi %253, %c4_i32_140 : i32
    %255 = arith.index_cast %254 : i32 to index
    %256 = memref.load %arg1[%255] : memref<56xi32, #tpu.memory_space<smem>>
    %257 = arith.index_cast %256 : i32 to index
    %c0_141 = arith.constant 0 : index
    %258 = vector.load %arg3[%257, %c0_141] : memref<64x32xf32, #tpu.memory_space<vmem>>, vector<1x32xf32>
    %c29 = arith.constant 29 : index
    %c0_142 = arith.constant 0 : index
    %259 = vector.load %arg7[%c29, %c0_142] : memref<48x32xf32, #tpu.memory_space<vmem>>, vector<1x32xf32>
    tpu.vector_store %arg7[%c29, %c0_142], %258 {strides = array<i32>} : memref<48x32xf32, #tpu.memory_space<vmem>>, vector<1x32xf32>,
    %c8_i32_143 = arith.constant 8 : i32
    %260 = arith.muli %arg0, %c8_i32_143 : i32
    %c5_i32 = arith.constant 5 : i32
    %261 = arith.addi %260, %c5_i32 : i32
    %c7_i32_144 = arith.constant 7 : i32
    %262 = arith.muli %261, %c7_i32_144 : i32
    %c0_i32_145 = arith.constant 0 : i32
    %263 = arith.addi %262, %c0_i32_145 : i32
    %264 = arith.index_cast %263 : i32 to index
    %265 = memref.load %arg1[%264] : memref<56xi32, #tpu.memory_space<smem>>
    %c1_i32_146 = arith.constant 1 : i32
    %266 = arith.addi %262, %c1_i32_146 : i32
    %267 = arith.index_cast %266 : i32 to index
    %268 = memref.load %arg1[%267] : memref<56xi32, #tpu.memory_space<smem>>
    %269 = arith.index_cast %265 : i32 to index
    %c0_147 = arith.constant 0 : index
    %270 = vector.load %arg2[%269, %c0_147] : memref<64x32xf32, #tpu.memory_space<vmem>>, vector<1x32xf32>
    %271 = vector.shape_cast %270 : vector<1x32xf32> to vector<1x32xf32>
    %272 = vector.broadcast %271 : vector<1x32xf32> to vector<6x32xf32>
    %c30 = arith.constant 30 : index
    %c0_148 = arith.constant 0 : index
    %273 = vector.load %arg8[%c30, %c0_148] : memref<48x32xf32, #tpu.memory_space<vmem>>, vector<6x32xf32>
    tpu.vector_store %arg8[%c30, %c0_148], %272 {strides = array<i32>} : memref<48x32xf32, #tpu.memory_space<vmem>>, vector<6x32xf32>,
    %274 = arith.index_cast %268 : i32 to index
    %c0_149 = arith.constant 0 : index
    %275 = vector.load %arg3[%274, %c0_149] : memref<64x32xf32, #tpu.memory_space<vmem>>, vector<1x32xf32>
    %c30_150 = arith.constant 30 : index
    %c0_151 = arith.constant 0 : index
    %276 = vector.load %arg7[%c30_150, %c0_151] : memref<48x32xf32, #tpu.memory_space<vmem>>, vector<1x32xf32>
    tpu.vector_store %arg7[%c30_150, %c0_151], %275 {strides = array<i32>} : memref<48x32xf32, #tpu.memory_space<vmem>>, vector<1x32xf32>,
    %c2_i32_152 = arith.constant 2 : i32
    %277 = arith.addi %262, %c2_i32_152 : i32
    %c0_i32_153 = arith.constant 0 : i32
    %278 = arith.addi %277, %c0_i32_153 : i32
    %279 = arith.index_cast %278 : i32 to index
    %280 = memref.load %arg1[%279] : memref<56xi32, #tpu.memory_space<smem>>
    %281 = arith.index_cast %280 : i32 to index
    %c0_154 = arith.constant 0 : index
    %282 = vector.load %arg3[%281, %c0_154] : memref<64x32xf32, #tpu.memory_space<vmem>>, vector<1x32xf32>
    %c31 = arith.constant 31 : index
    %c0_155 = arith.constant 0 : index
    %283 = vector.load %arg7[%c31, %c0_155] : memref<48x32xf32, #tpu.memory_space<vmem>>, vector<1x32xf32>
    tpu.vector_store %arg7[%c31, %c0_155], %282 {strides = array<i32>} : memref<48x32xf32, #tpu.memory_space<vmem>>, vector<1x32xf32>,
    %c2_i32_156 = arith.constant 2 : i32
    %284 = arith.addi %262, %c2_i32_156 : i32
    %c1_i32_157 = arith.constant 1 : i32
    %285 = arith.addi %284, %c1_i32_157 : i32
    %286 = arith.index_cast %285 : i32 to index
    %287 = memref.load %arg1[%286] : memref<56xi32, #tpu.memory_space<smem>>
    %288 = arith.index_cast %287 : i32 to index
    %c0_158 = arith.constant 0 : index
    %289 = vector.load %arg3[%288, %c0_158] : memref<64x32xf32, #tpu.memory_space<vmem>>, vector<1x32xf32>
    %c32 = arith.constant 32 : index
    %c0_159 = arith.constant 0 : index
    %290 = vector.load %arg7[%c32, %c0_159] : memref<48x32xf32, #tpu.memory_space<vmem>>, vector<1x32xf32>
    tpu.vector_store %arg7[%c32, %c0_159], %289 {strides = array<i32>} : memref<48x32xf32, #tpu.memory_space<vmem>>, vector<1x32xf32>,
    %c2_i32_160 = arith.constant 2 : i32
    %291 = arith.addi %262, %c2_i32_160 : i32
    %c2_i32_161 = arith.constant 2 : i32
    %292 = arith.addi %291, %c2_i32_161 : i32
    %293 = arith.index_cast %292 : i32 to index
    %294 = memref.load %arg1[%293] : memref<56xi32, #tpu.memory_space<smem>>
    %295 = arith.index_cast %294 : i32 to index
    %c0_162 = arith.constant 0 : index
    %296 = vector.load %arg3[%295, %c0_162] : memref<64x32xf32, #tpu.memory_space<vmem>>, vector<1x32xf32>
    %c33 = arith.constant 33 : index
    %c0_163 = arith.constant 0 : index
    %297 = vector.load %arg7[%c33, %c0_163] : memref<48x32xf32, #tpu.memory_space<vmem>>, vector<1x32xf32>
    tpu.vector_store %arg7[%c33, %c0_163], %296 {strides = array<i32>} : memref<48x32xf32, #tpu.memory_space<vmem>>, vector<1x32xf32>,
    %c2_i32_164 = arith.constant 2 : i32
    %298 = arith.addi %262, %c2_i32_164 : i32
    %c3_i32_165 = arith.constant 3 : i32
    %299 = arith.addi %298, %c3_i32_165 : i32
    %300 = arith.index_cast %299 : i32 to index
    %301 = memref.load %arg1[%300] : memref<56xi32, #tpu.memory_space<smem>>
    %302 = arith.index_cast %301 : i32 to index
    %c0_166 = arith.constant 0 : index
    %303 = vector.load %arg3[%302, %c0_166] : memref<64x32xf32, #tpu.memory_space<vmem>>, vector<1x32xf32>
    %c34 = arith.constant 34 : index
    %c0_167 = arith.constant 0 : index
    %304 = vector.load %arg7[%c34, %c0_167] : memref<48x32xf32, #tpu.memory_space<vmem>>, vector<1x32xf32>
    tpu.vector_store %arg7[%c34, %c0_167], %303 {strides = array<i32>} : memref<48x32xf32, #tpu.memory_space<vmem>>, vector<1x32xf32>,
    %c2_i32_168 = arith.constant 2 : i32
    %305 = arith.addi %262, %c2_i32_168 : i32
    %c4_i32_169 = arith.constant 4 : i32
    %306 = arith.addi %305, %c4_i32_169 : i32
    %307 = arith.index_cast %306 : i32 to index
    %308 = memref.load %arg1[%307] : memref<56xi32, #tpu.memory_space<smem>>
    %309 = arith.index_cast %308 : i32 to index
    %c0_170 = arith.constant 0 : index
    %310 = vector.load %arg3[%309, %c0_170] : memref<64x32xf32, #tpu.memory_space<vmem>>, vector<1x32xf32>
    %c35 = arith.constant 35 : index
    %c0_171 = arith.constant 0 : index
    %311 = vector.load %arg7[%c35, %c0_171] : memref<48x32xf32, #tpu.memory_space<vmem>>, vector<1x32xf32>
    tpu.vector_store %arg7[%c35, %c0_171], %310 {strides = array<i32>} : memref<48x32xf32, #tpu.memory_space<vmem>>, vector<1x32xf32>,
    %c8_i32_172 = arith.constant 8 : i32
    %312 = arith.muli %arg0, %c8_i32_172 : i32
    %c6_i32 = arith.constant 6 : i32
    %313 = arith.addi %312, %c6_i32 : i32
    %c7_i32_173 = arith.constant 7 : i32
    %314 = arith.muli %313, %c7_i32_173 : i32
    %c0_i32_174 = arith.constant 0 : i32
    %315 = arith.addi %314, %c0_i32_174 : i32
    %316 = arith.index_cast %315 : i32 to index
    %317 = memref.load %arg1[%316] : memref<56xi32, #tpu.memory_space<smem>>
    %c1_i32_175 = arith.constant 1 : i32
    %318 = arith.addi %314, %c1_i32_175 : i32
    %319 = arith.index_cast %318 : i32 to index
    %320 = memref.load %arg1[%319] : memref<56xi32, #tpu.memory_space<smem>>
    %321 = arith.index_cast %317 : i32 to index
    %c0_176 = arith.constant 0 : index
    %322 = vector.load %arg2[%321, %c0_176] : memref<64x32xf32, #tpu.memory_space<vmem>>, vector<1x32xf32>
    %323 = vector.shape_cast %322 : vector<1x32xf32> to vector<1x32xf32>
    %324 = vector.broadcast %323 : vector<1x32xf32> to vector<6x32xf32>
    %c36 = arith.constant 36 : index
    %c0_177 = arith.constant 0 : index
    %325 = vector.load %arg8[%c36, %c0_177] : memref<48x32xf32, #tpu.memory_space<vmem>>, vector<6x32xf32>
    tpu.vector_store %arg8[%c36, %c0_177], %324 {strides = array<i32>} : memref<48x32xf32, #tpu.memory_space<vmem>>, vector<6x32xf32>,
    %326 = arith.index_cast %320 : i32 to index
    %c0_178 = arith.constant 0 : index
    %327 = vector.load %arg3[%326, %c0_178] : memref<64x32xf32, #tpu.memory_space<vmem>>, vector<1x32xf32>
    %c36_179 = arith.constant 36 : index
    %c0_180 = arith.constant 0 : index
    %328 = vector.load %arg7[%c36_179, %c0_180] : memref<48x32xf32, #tpu.memory_space<vmem>>, vector<1x32xf32>
    tpu.vector_store %arg7[%c36_179, %c0_180], %327 {strides = array<i32>} : memref<48x32xf32, #tpu.memory_space<vmem>>, vector<1x32xf32>,
    %c2_i32_181 = arith.constant 2 : i32
    %329 = arith.addi %314, %c2_i32_181 : i32
    %c0_i32_182 = arith.constant 0 : i32
    %330 = arith.addi %329, %c0_i32_182 : i32
    %331 = arith.index_cast %330 : i32 to index
    %332 = memref.load %arg1[%331] : memref<56xi32, #tpu.memory_space<smem>>
    %333 = arith.index_cast %332 : i32 to index
    %c0_183 = arith.constant 0 : index
    %334 = vector.load %arg3[%333, %c0_183] : memref<64x32xf32, #tpu.memory_space<vmem>>, vector<1x32xf32>
    %c37 = arith.constant 37 : index
    %c0_184 = arith.constant 0 : index
    %335 = vector.load %arg7[%c37, %c0_184] : memref<48x32xf32, #tpu.memory_space<vmem>>, vector<1x32xf32>
    tpu.vector_store %arg7[%c37, %c0_184], %334 {strides = array<i32>} : memref<48x32xf32, #tpu.memory_space<vmem>>, vector<1x32xf32>,
    %c2_i32_185 = arith.constant 2 : i32
    %336 = arith.addi %314, %c2_i32_185 : i32
    %c1_i32_186 = arith.constant 1 : i32
    %337 = arith.addi %336, %c1_i32_186 : i32
    %338 = arith.index_cast %337 : i32 to index
    %339 = memref.load %arg1[%338] : memref<56xi32, #tpu.memory_space<smem>>
    %340 = arith.index_cast %339 : i32 to index
    %c0_187 = arith.constant 0 : index
    %341 = vector.load %arg3[%340, %c0_187] : memref<64x32xf32, #tpu.memory_space<vmem>>, vector<1x32xf32>
    %c38 = arith.constant 38 : index
    %c0_188 = arith.constant 0 : index
    %342 = vector.load %arg7[%c38, %c0_188] : memref<48x32xf32, #tpu.memory_space<vmem>>, vector<1x32xf32>
    tpu.vector_store %arg7[%c38, %c0_188], %341 {strides = array<i32>} : memref<48x32xf32, #tpu.memory_space<vmem>>, vector<1x32xf32>,
    %c2_i32_189 = arith.constant 2 : i32
    %343 = arith.addi %314, %c2_i32_189 : i32
    %c2_i32_190 = arith.constant 2 : i32
    %344 = arith.addi %343, %c2_i32_190 : i32
    %345 = arith.index_cast %344 : i32 to index
    %346 = memref.load %arg1[%345] : memref<56xi32, #tpu.memory_space<smem>>
    %347 = arith.index_cast %346 : i32 to index
    %c0_191 = arith.constant 0 : index
    %348 = vector.load %arg3[%347, %c0_191] : memref<64x32xf32, #tpu.memory_space<vmem>>, vector<1x32xf32>
    %c39 = arith.constant 39 : index
    %c0_192 = arith.constant 0 : index
    %349 = vector.load %arg7[%c39, %c0_192] : memref<48x32xf32, #tpu.memory_space<vmem>>, vector<1x32xf32>
    tpu.vector_store %arg7[%c39, %c0_192], %348 {strides = array<i32>} : memref<48x32xf32, #tpu.memory_space<vmem>>, vector<1x32xf32>,
    %c2_i32_193 = arith.constant 2 : i32
    %350 = arith.addi %314, %c2_i32_193 : i32
    %c3_i32_194 = arith.constant 3 : i32
    %351 = arith.addi %350, %c3_i32_194 : i32
    %352 = arith.index_cast %351 : i32 to index
    %353 = memref.load %arg1[%352] : memref<56xi32, #tpu.memory_space<smem>>
    %354 = arith.index_cast %353 : i32 to index
    %c0_195 = arith.constant 0 : index
    %355 = vector.load %arg3[%354, %c0_195] : memref<64x32xf32, #tpu.memory_space<vmem>>, vector<1x32xf32>
    %c40 = arith.constant 40 : index
    %c0_196 = arith.constant 0 : index
    %356 = vector.load %arg7[%c40, %c0_196] : memref<48x32xf32, #tpu.memory_space<vmem>>, vector<1x32xf32>
    tpu.vector_store %arg7[%c40, %c0_196], %355 {strides = array<i32>} : memref<48x32xf32, #tpu.memory_space<vmem>>, vector<1x32xf32>,
    %c2_i32_197 = arith.constant 2 : i32
    %357 = arith.addi %314, %c2_i32_197 : i32
    %c4_i32_198 = arith.constant 4 : i32
    %358 = arith.addi %357, %c4_i32_198 : i32
    %359 = arith.index_cast %358 : i32 to index
    %360 = memref.load %arg1[%359] : memref<56xi32, #tpu.memory_space<smem>>
    %361 = arith.index_cast %360 : i32 to index
    %c0_199 = arith.constant 0 : index
    %362 = vector.load %arg3[%361, %c0_199] : memref<64x32xf32, #tpu.memory_space<vmem>>, vector<1x32xf32>
    %c41 = arith.constant 41 : index
    %c0_200 = arith.constant 0 : index
    %363 = vector.load %arg7[%c41, %c0_200] : memref<48x32xf32, #tpu.memory_space<vmem>>, vector<1x32xf32>
    tpu.vector_store %arg7[%c41, %c0_200], %362 {strides = array<i32>} : memref<48x32xf32, #tpu.memory_space<vmem>>, vector<1x32xf32>,
    %c8_i32_201 = arith.constant 8 : i32
    %364 = arith.muli %arg0, %c8_i32_201 : i32
    %c7_i32_202 = arith.constant 7 : i32
    %365 = arith.addi %364, %c7_i32_202 : i32
    %c7_i32_203 = arith.constant 7 : i32
    %366 = arith.muli %365, %c7_i32_203 : i32
    %c0_i32_204 = arith.constant 0 : i32
    %367 = arith.addi %366, %c0_i32_204 : i32
    %368 = arith.index_cast %367 : i32 to index
    %369 = memref.load %arg1[%368] : memref<56xi32, #tpu.memory_space<smem>>
    %c1_i32_205 = arith.constant 1 : i32
    %370 = arith.addi %366, %c1_i32_205 : i32
    %371 = arith.index_cast %370 : i32 to index
    %372 = memref.load %arg1[%371] : memref<56xi32, #tpu.memory_space<smem>>
    %373 = arith.index_cast %369 : i32 to index
    %c0_206 = arith.constant 0 : index
    %374 = vector.load %arg2[%373, %c0_206] : memref<64x32xf32, #tpu.memory_space<vmem>>, vector<1x32xf32>
    %375 = vector.shape_cast %374 : vector<1x32xf32> to vector<1x32xf32>
    %376 = vector.broadcast %375 : vector<1x32xf32> to vector<6x32xf32>
    %c42 = arith.constant 42 : index
    %c0_207 = arith.constant 0 : index
    %377 = vector.load %arg8[%c42, %c0_207] : memref<48x32xf32, #tpu.memory_space<vmem>>, vector<6x32xf32>
    tpu.vector_store %arg8[%c42, %c0_207], %376 {strides = array<i32>} : memref<48x32xf32, #tpu.memory_space<vmem>>, vector<6x32xf32>,
    %378 = arith.index_cast %372 : i32 to index
    %c0_208 = arith.constant 0 : index
    %379 = vector.load %arg3[%378, %c0_208] : memref<64x32xf32, #tpu.memory_space<vmem>>, vector<1x32xf32>
    %c42_209 = arith.constant 42 : index
    %c0_210 = arith.constant 0 : index
    %380 = vector.load %arg7[%c42_209, %c0_210] : memref<48x32xf32, #tpu.memory_space<vmem>>, vector<1x32xf32>
    tpu.vector_store %arg7[%c42_209, %c0_210], %379 {strides = array<i32>} : memref<48x32xf32, #tpu.memory_space<vmem>>, vector<1x32xf32>,
    %c2_i32_211 = arith.constant 2 : i32
    %381 = arith.addi %366, %c2_i32_211 : i32
    %c0_i32_212 = arith.constant 0 : i32
    %382 = arith.addi %381, %c0_i32_212 : i32
    %383 = arith.index_cast %382 : i32 to index
    %384 = memref.load %arg1[%383] : memref<56xi32, #tpu.memory_space<smem>>
    %385 = arith.index_cast %384 : i32 to index
    %c0_213 = arith.constant 0 : index
    %386 = vector.load %arg3[%385, %c0_213] : memref<64x32xf32, #tpu.memory_space<vmem>>, vector<1x32xf32>
    %c43 = arith.constant 43 : index
    %c0_214 = arith.constant 0 : index
    %387 = vector.load %arg7[%c43, %c0_214] : memref<48x32xf32, #tpu.memory_space<vmem>>, vector<1x32xf32>
    tpu.vector_store %arg7[%c43, %c0_214], %386 {strides = array<i32>} : memref<48x32xf32, #tpu.memory_space<vmem>>, vector<1x32xf32>,
    %c2_i32_215 = arith.constant 2 : i32
    %388 = arith.addi %366, %c2_i32_215 : i32
    %c1_i32_216 = arith.constant 1 : i32
    %389 = arith.addi %388, %c1_i32_216 : i32
    %390 = arith.index_cast %389 : i32 to index
    %391 = memref.load %arg1[%390] : memref<56xi32, #tpu.memory_space<smem>>
    %392 = arith.index_cast %391 : i32 to index
    %c0_217 = arith.constant 0 : index
    %393 = vector.load %arg3[%392, %c0_217] : memref<64x32xf32, #tpu.memory_space<vmem>>, vector<1x32xf32>
    %c44 = arith.constant 44 : index
    %c0_218 = arith.constant 0 : index
    %394 = vector.load %arg7[%c44, %c0_218] : memref<48x32xf32, #tpu.memory_space<vmem>>, vector<1x32xf32>
    tpu.vector_store %arg7[%c44, %c0_218], %393 {strides = array<i32>} : memref<48x32xf32, #tpu.memory_space<vmem>>, vector<1x32xf32>,
    %c2_i32_219 = arith.constant 2 : i32
    %395 = arith.addi %366, %c2_i32_219 : i32
    %c2_i32_220 = arith.constant 2 : i32
    %396 = arith.addi %395, %c2_i32_220 : i32
    %397 = arith.index_cast %396 : i32 to index
    %398 = memref.load %arg1[%397] : memref<56xi32, #tpu.memory_space<smem>>
    %399 = arith.index_cast %398 : i32 to index
    %c0_221 = arith.constant 0 : index
    %400 = vector.load %arg3[%399, %c0_221] : memref<64x32xf32, #tpu.memory_space<vmem>>, vector<1x32xf32>
    %c45 = arith.constant 45 : index
    %c0_222 = arith.constant 0 : index
    %401 = vector.load %arg7[%c45, %c0_222] : memref<48x32xf32, #tpu.memory_space<vmem>>, vector<1x32xf32>
    tpu.vector_store %arg7[%c45, %c0_222], %400 {strides = array<i32>} : memref<48x32xf32, #tpu.memory_space<vmem>>, vector<1x32xf32>,
    %c2_i32_223 = arith.constant 2 : i32
    %402 = arith.addi %366, %c2_i32_223 : i32
    %c3_i32_224 = arith.constant 3 : i32
    %403 = arith.addi %402, %c3_i32_224 : i32
    %404 = arith.index_cast %403 : i32 to index
    %405 = memref.load %arg1[%404] : memref<56xi32, #tpu.memory_space<smem>>
    %406 = arith.index_cast %405 : i32 to index
    %c0_225 = arith.constant 0 : index
    %407 = vector.load %arg3[%406, %c0_225] : memref<64x32xf32, #tpu.memory_space<vmem>>, vector<1x32xf32>
    %c46 = arith.constant 46 : index
    %c0_226 = arith.constant 0 : index
    %408 = vector.load %arg7[%c46, %c0_226] : memref<48x32xf32, #tpu.memory_space<vmem>>, vector<1x32xf32>
    tpu.vector_store %arg7[%c46, %c0_226], %407 {strides = array<i32>} : memref<48x32xf32, #tpu.memory_space<vmem>>, vector<1x32xf32>,
    %c2_i32_227 = arith.constant 2 : i32
    %409 = arith.addi %366, %c2_i32_227 : i32
    %c4_i32_228 = arith.constant 4 : i32
    %410 = arith.addi %409, %c4_i32_228 : i32
    %411 = arith.index_cast %410 : i32 to index
    %412 = memref.load %arg1[%411] : memref<56xi32, #tpu.memory_space<smem>>
    %413 = arith.index_cast %412 : i32 to index
    %c0_229 = arith.constant 0 : index
    %414 = vector.load %arg3[%413, %c0_229] : memref<64x32xf32, #tpu.memory_space<vmem>>, vector<1x32xf32>
    %c47 = arith.constant 47 : index
    %c0_230 = arith.constant 0 : index
    %415 = vector.load %arg7[%c47, %c0_230] : memref<48x32xf32, #tpu.memory_space<vmem>>, vector<1x32xf32>
    tpu.vector_store %arg7[%c47, %c0_230], %414 {strides = array<i32>} : memref<48x32xf32, #tpu.memory_space<vmem>>, vector<1x32xf32>,
    %c0_231 = arith.constant 0 : index
    %c0_232 = arith.constant 0 : index
    %416 = vector.load %arg7[%c0_231, %c0_232] : memref<48x32xf32, #tpu.memory_space<vmem>>, vector<48x32xf32>
    %c0_233 = arith.constant 0 : index
    %c0_234 = arith.constant 0 : index
    %417 = vector.load %arg8[%c0_233, %c0_234] : memref<48x32xf32, #tpu.memory_space<vmem>>, vector<48x32xf32>
    %418 = arith.mulf %416, %417 : vector<48x32xf32>
    %cst = arith.constant dense<0.000000e+00> : vector<48xf32>
    %419 = vector.multi_reduction <add>, %418, %cst [1] : vector<48x32xf32> to vector<48xf32>
    %420 = vector.shape_cast %419 : vector<48xf32> to vector<48x1xf32>
    %c0_235 = arith.constant 0 : index
    %c0_236 = arith.constant 0 : index
    %421 = vector.load %arg5[%c0_235, %c0_236] : memref<48x1xf32, #tpu.memory_space<vmem>>, vector<48x1xf32>
    %c0_237 = arith.constant 0 : index
    %c0_238 = arith.constant 0 : index
    %422 = vector.load %arg4[%c0_237, %c0_238] : memref<48x1xf32, #tpu.memory_space<vmem>>, vector<48x1xf32>
    %423 = arith.mulf %422, %420 : vector<48x1xf32>
    %cst_239 = arith.constant 0.000000e+00 : f32
    %424 = vector.broadcast %cst_239 : f32 to vector<48x1xf32>
    %425 = arith.minimumf %423, %424 : vector<48x1xf32>
    %426 = math.absf %423 : vector<48x1xf32>
    %cst_240 = arith.constant 0.000000e+00 : f32
    %427 = vector.broadcast %cst_240 : f32 to vector<48x1xf32>
    %428 = arith.subf %427, %426 : vector<48x1xf32>
    %429 = math.exp %428 : vector<48x1xf32>
    %cst_241 = arith.constant 1.000000e+00 : f32
    %430 = vector.broadcast %cst_241 : f32 to vector<48x1xf32>
    %431 = arith.addf %430, %429 : vector<48x1xf32>
    %432 = math.log %431 : vector<48x1xf32>
    %433 = arith.subf %425, %432 : vector<48x1xf32>
    %434 = arith.mulf %421, %433 : vector<48x1xf32>
    %435 = vector.shape_cast %434 : vector<48x1xf32> to vector<1x48x1xf32>
    %cst_242 = arith.constant dense<0.000000e+00> : vector<1xf32>
    %436 = vector.multi_reduction <add>, %435, %cst_242 [1, 2] : vector<1x48x1xf32> to vector<1xf32>
    %437 = vector.shape_cast %436 : vector<1xf32> to vector<1x1x1xf32>
    %438 = vector.extract %437[0, 0, 0] : f32 from vector<1x1x1xf32>
    %439 = vector.broadcast %438 : f32 to vector<1x1xf32>
    %c0_243 = arith.constant 0 : index
    %c0_244 = arith.constant 0 : index
    %440 = vector.load %arg6[%c0_243, %c0_244] : memref<1x1xf32, #tpu.memory_space<vmem>>, vector<1x1xf32>
    tpu.vector_store %arg6[%c0_243, %c0_244], %439 {strides = array<i32>} : memref<1x1xf32, #tpu.memory_space<vmem>>, vector<1x1xf32>,
    return
  }
  func.func @transform_0(%arg0: i32, %arg1: memref<56xi32, #tpu.memory_space<smem>>) -> (i32, i32) {
    %c0_i32 = arith.constant 0 : i32
    %c0_i32_0 = arith.constant 0 : i32
    %c0_i32_1 = arith.constant 0 : i32
    return %c0_i32, %c0_i32_0 : i32, i32
  }
  func.func @transform_1(%arg0: i32, %arg1: memref<56xi32, #tpu.memory_space<smem>>) -> (i32, i32) {
    %c0_i32 = arith.constant 0 : i32
    %c0_i32_0 = arith.constant 0 : i32
    %c0_i32_1 = arith.constant 0 : i32
    return %c0_i32, %c0_i32_0 : i32, i32
  }
  func.func @transform_2(%arg0: i32, %arg1: memref<56xi32, #tpu.memory_space<smem>>) -> (i32, i32) {
    %c0_i32 = arith.constant 0 : i32
    %c0_i32_0 = arith.constant 0 : i32
    %c0_i32_1 = arith.constant 0 : i32
    return %c0_i32, %c0_i32_0 : i32, i32
  }
  func.func @transform_3(%arg0: i32, %arg1: memref<56xi32, #tpu.memory_space<smem>>) -> (i32, i32) {
    %c0_i32 = arith.constant 0 : i32
    %c0_i32_0 = arith.constant 0 : i32
    %c0_i32_1 = arith.constant 0 : i32
    return %c0_i32, %c0_i32_0 : i32, i32
  }
  func.func @transform_4(%arg0: i32, %arg1: memref<56xi32, #tpu.memory_space<smem>>) -> (i32, i32) {
    %c0_i32 = arith.constant 0 : i32
    %c0_i32_0 = arith.constant 0 : i32
    return %arg0, %c0_i32 : i32, i32
  }
}

</mosaic_0001>

<bundles_post_ra>
// kernel: tpu_custom_call.1
= control target key start
LH: loop header
LB: loop body
LE: loop exit
PB: predicated region body
PF: predicated region fallthrough
CT: control target
= control target key end

     0   :  { %s1098_s0 = inlined_call_operand.vmem [shape: s32[56], index: 0, kind: input, shape index: {}]   ;;  %s1099_s1 = inlined_call_operand.vmem [shape: f32[64,32], index: 1, kind: input, shape index: {}]   ;;  %s1100_s2 = inlined_call_operand.vmem [shape: f32[64,32], index: 2, kind: input, shape index: {}]   ;;  %s1101_s3 = inlined_call_operand.vmem [shape: f32[48,1], index: 3, kind: input, shape index: {}]   ;;  %s1102_s4 = inlined_call_operand.vmem [shape: f32[48,1], index: 4, kind: input, shape index: {}]   ;;  %s1103_s5 = inlined_call_operand.hbm [shape: f32[1,1], index: 5, kind: output, shape index: {}]  }
   0x1   :  { %s10_s20 = sshll.u32 %s1098_s0, 4  ;;  %s11_s20 = int_to_ptr.vmem [resolvable:$true] %s10_s20 }
   0x2   :  { %s647_s21 = scalar_lea.vmem %s11_s20, 16  ;;  %p652_p1 = scmp.lt.s32.totalorder %s11_s20, %s11_s20 }
   0x3   :  { %p648_p0 = scmp.ne.s32.totalorder %s11_s20, %s647_s21  ;;  %p653_p2 = scmp.lt.s32.totalorder %s647_s21, %s647_s21 }
   0x5   :  { %p654_p3 = por %p653_p2, %p652_p1 }
   0x7   :  { %p655_p4 = pnand %p654_p3, %p648_p0 }
   0x9   :  { %658 = shalt.err (!%p655_p4)  }
   0xa   :  { %s685_s22 = smov [#allocation5]  }
   0xb   :  { %13 = dma.vmem_to_smem %s11_s20, 16, %s685_s22, [#allocation4] }
   0xc   :  { %681 = dma.done.wait [#allocation4], 16 }
   0xd   :  { %682 = vsyncadd [#allocation4], 4294967280 }
   0xe   :  { %15 = sfence }
   0xf   :  { %s571_s23 = sld [smem:[#allocation5 + $0xe]]  ;;  %s577_s24 = sld [smem:[#allocation5 + $0x13]] }
  0x10   :  { %s578_s25 = sld [smem:[#allocation5 + $0x14]]  ;;  %s579_s26 = sld [smem:[#allocation5 + $0x15]] }
  0x11   :  { %s580_s27 = sld [smem:[#allocation5 + $0x16]]  ;;  %s582_s28 = sld [smem:[#allocation5 + $0x17]] }
  0x12   :  { %s720_s0 = sld [smem:[#allocation5 + $0x18]]  ;;  %s722_s29 = sld [smem:[#allocation5 + $0x19]] }
  0x13   :  { %16 = vsyncpa [#allocation7], 0  ;;  %s724_s30 = sld [smem:[#allocation5 + $0x1a]]  ;;  %s726_s6 = sld [smem:[#allocation5 + $0x1b]]  ;;  %vm35_vm0 = vcmask 259072   ;;  %vm39_vm1 = vcmask 253952  }
  0x14   :  { %s728_s7 = sld [smem:[#allocation5]]  ;;  %s730_s8 = sld [smem:[#allocation5 + $0x1]]  ;;  %vm365_vm2 = vcmask 261120   ;;  %vm462_vm3 = vcmask 7168   ;;  %vm484_vm4 = vcmask 0  }
  0x15   :  { %s112_s11 = scalar_lea.vmem %s1099_s1, %s571_s23  ;;  %s139_s14 = scalar_lea.vmem %s1100_s2, %s577_s24 }
  0x16   :  { %v573_v0 = vld [vmem:[%s112_s11] ss:$0 sm:$0xff]  ;;  %s144_s17 = scalar_lea.vmem %s1100_s2, %s578_s25  ;;  %s152_s20 = scalar_lea.vmem %s1099_s1, %s579_s26 }
  0x17   :  { %v140_v1 = vld [vmem:[%s139_s14] sm:$0x1]  ;;  %118 = vst.msk [vmem:[#allocation3 + $0xc] sm:$0x3f] %vm35_vm0, %v573_v0  ;;  %s159_s23 = scalar_lea.vmem %s1100_s2, %s580_s27  ;;  %s164_s25 = scalar_lea.vmem %s1100_s2, %s582_s28 }
  0x18   :  { %141 = vst.msk [vmem:[#allocation2 + $0x10] sm:$0x1] %vm39_vm1, %v140_v1  ;;  %v145_v2 = vld [vmem:[%s144_s17] sm:$0x1]  ;;  %s169_s11 = scalar_lea.vmem %s1100_s2, %s720_s0  ;;  %s174_s27 = scalar_lea.vmem %s1100_s2, %s722_s29 }
  0x19   :  { %v581_v3 = vld [vmem:[%s152_s20] ss:$0 sm:$0xff]  ;;  %146 = vst.msk [vmem:[#allocation2 + $0x11] sm:$0x1] %vm39_vm1, %v145_v2  ;;  %s179_s15 = scalar_lea.vmem %s1100_s2, %s724_s30  ;;  %s184_s18 = scalar_lea.vmem %s1100_s2, %s726_s6 }
  0x1a   :  { %158 = vst.msk [vmem:[#allocation3 + $0x12] sm:$0x3f] %vm35_vm0, %v581_v3  ;;  %v160_v4 = vld [vmem:[%s159_s23] sm:$0x1]  ;;  %s29_s19 = scalar_lea.vmem %s1099_s1, %s728_s7  ;;  %s37_s22 = scalar_lea.vmem %s1100_s2, %s730_s8 }
  0x1b   :  { %v165_v5 = vld [vmem:[%s164_s25] sm:$0x1]  ;;  %161 = vst.msk [vmem:[#allocation2 + $0x12] sm:$0x1] %vm39_vm1, %v160_v4  ;;  %s558_s30 = sld [smem:[#allocation5 + $0x2]]  ;;  %s559_s6 = sld [smem:[#allocation5 + $0x3]] }
  0x1c   :  { %166 = vst.msk [vmem:[#allocation2 + $0x13] sm:$0x1] %vm39_vm1, %v165_v5  ;;  %v170_v6 = vld [vmem:[%s169_s11] sm:$0x1]  ;;  %s560_s23 = sld [smem:[#allocation5 + $0x4]]  ;;  %s561_s24 = sld [smem:[#allocation5 + $0x5]] }
  0x1d   :  { %v175_v7 = vld [vmem:[%s174_s27] sm:$0x1]  ;;  %171 = vst.msk [vmem:[#allocation2 + $0x14] sm:$0x1] %vm39_vm1, %v170_v6  ;;  %s562_s9 = sld [smem:[#allocation5 + $0x6]]  ;;  %s786_s7 = sld [smem:[#allocation5 + $0x7]] }
  0x1e   :  { %176 = vst.msk [vmem:[#allocation2 + $0x15] sm:$0x1] %vm39_vm1, %v175_v7  ;;  %v180_v8 = vld [vmem:[%s179_s15] sm:$0x1]  ;;  %s788_s25 = sld [smem:[#allocation5 + $0x8]]  ;;  %s790_s8 = sld [smem:[#allocation5 + $0x9]] }
  0x1f   :  { %v185_v9 = vld [vmem:[%s184_s18] sm:$0x1]  ;;  %181 = vst.msk [vmem:[#allocation2 + $0x16] sm:$0x1] %vm39_vm1, %v180_v8  ;;  %s792_s26 = sld [smem:[#allocation5 + $0x1c]]  ;;  %s794_s10 = sld [smem:[#allocation5 + $0x1d]] }
  0x20   :  { %186 = vst.msk [vmem:[#allocation2 + $0x17] sm:$0x1] %vm39_vm1, %v185_v9  ;;  %v557_v10 = vld [vmem:[%s29_s19] ss:$0 sm:$0xff]  ;;  %s796_s11 = sld [smem:[#allocation5 + $0x1e]]  ;;  %s801_s28 = sld [smem:[#allocation5 + $0x1f]] }
  0x21   :  { %v38_v11 = vld [vmem:[%s37_s22] sm:$0x1]  ;;  %36 = vst.msk [vmem:[#allocation3] sm:$0x3f] %vm35_vm0, %v557_v10  ;;  %s43_s27 = scalar_lea.vmem %s1100_s2, %s558_s30  ;;  %s48_s16 = scalar_lea.vmem %s1100_s2, %s559_s6 }
  0x22   :  { %40 = vst.msk [vmem:[#allocation2] sm:$0x1] %vm39_vm1, %v38_v11  ;;  %v355_v12 = vld [vmem:[#allocation3 + $0x10] sm:$0xff]  ;;  %s53_s0 = scalar_lea.vmem %s1100_s2, %s560_s23  ;;  %s58_s20 = scalar_lea.vmem %s1100_s2, %s561_s24 }
  0x23   :  { %v44_v14 = vld [vmem:[%s43_s27] sm:$0x1]  ;;  %s63_s30 = scalar_lea.vmem %s1100_s2, %s562_s9  ;;  %s72_s12 = scalar_lea.vmem %s1099_s1, %s786_s7 }
  0x24   :  { %45 = vst.msk [vmem:[#allocation2 + $0x1] sm:$0x1] %vm39_vm1, %v44_v14  ;;  %v49_v16 = vld [vmem:[%s48_s16] sm:$0x1]  ;;  %s79_s24 = scalar_lea.vmem %s1100_s2, %s788_s25  ;;  %s84_s15 = scalar_lea.vmem %s1100_s2, %s790_s8 }
  0x25   :  { %v54_v17 = vld [vmem:[%s53_s0] sm:$0x1]  ;;  %50 = vst.msk [vmem:[#allocation2 + $0x2] sm:$0x1] %vm39_vm1, %v49_v16  ;;  %s192_s7 = scalar_lea.vmem %s1099_s1, %s792_s26  ;;  %s199_s0 = scalar_lea.vmem %s1100_s2, %s794_s10 }
  0x26   :  { %55 = vst.msk [vmem:[#allocation2 + $0x3] sm:$0x1] %vm39_vm1, %v54_v17  ;;  %v59_v18 = vld [vmem:[%s58_s20] sm:$0x1]  ;;  %s204_s20 = scalar_lea.vmem %s1100_s2, %s796_s11  ;;  %s209_s21 = scalar_lea.vmem %s1100_s2, %s801_s28 }
  0x27   :  { %v349_v13 = vld [vmem:[#allocation2 + $0x10] sm:$0xff]  ;;  %v64_v19 = vld [vmem:[%s63_s30] sm:$0x1]  ;;  %60 = vst.msk [vmem:[#allocation2 + $0x4] sm:$0x1] %vm39_vm1, %v59_v18  ;;  %s592_s22 = sld [smem:[#allocation5 + $0x20]] }
  0x28   :  { %v361_v15 = vmul.f32 %v355_v12, %v349_v13  ;;  %65 = vst.msk [vmem:[#allocation2 + $0x5] sm:$0x1] %vm39_vm1, %v64_v19  ;;  %v565_v21 = vld [vmem:[%s72_s12] ss:$0 sm:$0xff]  ;;  %s593_s10 = sld [smem:[#allocation5 + $0x21]]  ;;  %s594_s30 = sld [smem:[#allocation5 + $0x22]] }
  0x29   :  { %v80_v22 = vld [vmem:[%s79_s24] sm:$0x1]  ;;  %78 = vst.msk [vmem:[#allocation3 + $0x6] sm:$0x3f] %vm35_vm0, %v565_v21  ;;  %s595_s11 = sld [smem:[#allocation5 + $0x23]]  ;;  %s596_s6 = sld [smem:[#allocation5 + $0x24]] }
  0x2a   :  { %v372_v20 = vsel %vm365_vm2, %v361_v15, 0.0  ;;  %81 = vst.msk [vmem:[#allocation2 + $0x6] sm:$0x1] %vm39_vm1, %v80_v22  ;;  %v85_v23 = vld [vmem:[%s84_s15] sm:$0x1]  ;;  %s598_s23 = sld [smem:[#allocation5 + $0x25]] }
  0x2b   :  { %373 = vadd.xlane.f32.xlu1 %v372_v20  ;;  %v589_v24 = vld [vmem:[%s192_s7] ss:$0 sm:$0xff]  ;;  %86 = vst.msk [vmem:[#allocation2 + $0x7] sm:$0x1] %vm39_vm1, %v85_v23  ;;  %s567_s12 = sld [smem:[#allocation5 + $0xa]]  ;;  %s856_s13 = sld [smem:[#allocation5 + $0xb]] }
  0x2c   :  { %198 = vst.msk [vmem:[#allocation3 + $0x18] sm:$0x3f] %vm35_vm0, %v589_v24  ;;  %v200_v25 = vld [vmem:[%s199_s0] sm:$0x1]  ;;  %s858_s27 = sld [smem:[#allocation5 + $0xc]]  ;;  %s860_s24 = sld [smem:[#allocation5 + $0xd]] }
  0x2d   :  { %v205_v26 = vld [vmem:[%s204_s20] sm:$0x1]  ;;  %201 = vst.msk [vmem:[#allocation2 + $0x18] sm:$0x1] %vm39_vm1, %v200_v25  ;;  %s862_s28 = sld [smem:[#allocation5 + $0xf]]  ;;  %s214_s15 = scalar_lea.vmem %s1100_s2, %s592_s22  ;;  %v392_v20 = vld [vmem:[%s1101_s3 + $0x10] sm:$0xff] }
  0x2e   :  { %206 = vst.msk [vmem:[#allocation2 + $0x19] sm:$0x1] %vm39_vm1, %v205_v26  ;;  %v210_v27 = vld [vmem:[%s209_s21] sm:$0x1]  ;;  %s867_s16 = sld [smem:[#allocation5 + $0x10]]  ;;  %s219_s25 = scalar_lea.vmem %s1100_s2, %s593_s10  ;;  %v393_v23 = vld [vmem:[%s1101_s3 + $0x18] sm:$0xff] }
  0x2f   :  { %211 = vst.msk [vmem:[#allocation2 + $0x1a] sm:$0x1] %vm39_vm1, %v210_v27  ;;  %v215_v30 = vld [vmem:[%s214_s15] sm:$0x1]  ;;  %s224_s29 = scalar_lea.vmem %s1100_s2, %s594_s30  ;;  %s232_s8 = scalar_lea.vmem %s1099_s1, %s595_s11 }
  0x30   :  { %v353_v28 = vld [vmem:[#allocation3] sm:$0xff]  ;;  %216 = vst.msk [vmem:[#allocation2 + $0x1b] sm:$0x1] %vm39_vm1, %v215_v30  ;;  %v220_v32 = vld [vmem:[%s219_s25] sm:$0x1]  ;;  %s239_s22 = scalar_lea.vmem %s1100_s2, %s596_s6  ;;  %s244_s9 = scalar_lea.vmem %s1100_s2, %s598_s23  ;;  %v354_v60 = vld [vmem:[#allocation3 + $0x8] sm:$0xff] }
  0x31   :  { %v225_v33 = vld [vmem:[%s224_s29] sm:$0x1]  ;;  %221 = vst.msk [vmem:[#allocation2 + $0x1c] sm:$0x1] %vm39_vm1, %v220_v32  ;;  %s89_s11 = scalar_lea.vmem %s1100_s2, %s567_s12  ;;  %s94_s7 = scalar_lea.vmem %s1100_s2, %s856_s13 }
  0x32   :  { %v347_v29 = vld [vmem:[#allocation2] sm:$0xff]  ;;  %226 = vst.msk [vmem:[#allocation2 + $0x1d] sm:$0x1] %vm39_vm1, %v225_v33  ;;  %s99_s23 = scalar_lea.vmem %s1100_s2, %s858_s27  ;;  %s104_s29 = scalar_lea.vmem %s1100_s2, %s860_s24 }
  0x33   :  { %v359_v31 = vmul.f32 %v353_v28, %v347_v29  ;;  %v597_v34 = vld [vmem:[%s232_s8] ss:$0 sm:$0xff]  ;;  %s119_s8 = scalar_lea.vmem %s1100_s2, %s862_s28  ;;  %s575_s21 = sld [smem:[#allocation5 + $0x11]] }
  0x34   :  { %v240_v35 = vld [vmem:[%s239_s22] sm:$0x1]  ;;  %238 = vst.msk [vmem:[#allocation3 + $0x1e] sm:$0x3f] %vm35_vm0, %v597_v34  ;;  %s124_s26 = scalar_lea.vmem %s1100_s2, %s867_s16  ;;  %s576_s24 = sld [smem:[#allocation5 + $0x12]] }
  0x35   :  { %v366_v36 = vsel %vm365_vm2, %v359_v31, 0.0  ;;  %241 = vst.msk [vmem:[#allocation2 + $0x1e] sm:$0x1] %vm39_vm1, %v240_v35  ;;  %v245_v37 = vld [vmem:[%s244_s9] sm:$0x1]  ;;  %s603_s22 = sld [smem:[#allocation5 + $0x2a]] }
  0x36   :  { %v90_v38 = vld [vmem:[%s89_s11] sm:$0x1]  ;;  %367 = vadd.xlane.f32.xlu0 %v366_v36  ;;  %246 = vst.msk [vmem:[#allocation2 + $0x1f] sm:$0x1] %vm39_vm1, %v245_v37  ;;  %s609_s28 = sld [smem:[#allocation5 + $0x2f]]  ;;  %s610_s10 = sld [smem:[#allocation5 + $0x30]] }
  0x37   :  { %91 = vst.msk [vmem:[#allocation2 + $0x8] sm:$0x1] %vm39_vm1, %v90_v38  ;;  %v95_v39 = vld [vmem:[%s94_s7] sm:$0x1]  ;;  %s920_s30 = sld [smem:[#allocation5 + $0x31]]  ;;  %s922_s9 = sld [smem:[#allocation5 + $0x32]] }
  0x38   :  { %v100_v40 = vld [vmem:[%s99_s23] sm:$0x1]  ;;  %96 = vst.msk [vmem:[#allocation2 + $0x9] sm:$0x1] %vm39_vm1, %v95_v39  ;;  %s924_s14 = sld [smem:[#allocation5 + $0x33]]  ;;  %s926_s15 = sld [smem:[#allocation5 + $0x34]] }
  0x39   :  { %101 = vst.msk [vmem:[#allocation2 + $0xa] sm:$0x1] %vm39_vm1, %v100_v40  ;;  %v105_v41 = vld [vmem:[%s104_s29] sm:$0x1]  ;;  %s928_s16 = sld [smem:[#allocation5 + $0x35]]  ;;  %s930_s11 = sld [smem:[#allocation5 + $0x36]] }
  0x3a   :  { %v120_v42 = vld [vmem:[%s119_s8] sm:$0x1]  ;;  %106 = vst.msk [vmem:[#allocation2 + $0xb] sm:$0x1] %vm39_vm1, %v105_v41  ;;  %s129_s7 = scalar_lea.vmem %s1100_s2, %s575_s21  ;;  %s935_s25 = sld [smem:[#allocation5 + $0x37]]  ;;  %v391_v31 = vld [vmem:[%s1101_s3 + $0x8] sm:$0xff] }
  0x3b   :  { %121 = vst.msk [vmem:[#allocation2 + $0xc] sm:$0x1] %vm39_vm1, %v120_v42  ;;  %v125_v43 = vld [vmem:[%s124_s26] sm:$0x1]  ;;  %v356_v44 = vld [vmem:[#allocation3 + $0x18] sm:$0xff]  ;;  %s134_s12 = scalar_lea.vmem %s1100_s2, %s576_s24  ;;  %s272_s19 = scalar_lea.vmem %s1099_s1, %s603_s22 }
  0x3c   :  { %126 = vst.msk [vmem:[#allocation2 + $0xd] sm:$0x1] %vm39_vm1, %v125_v43  ;;  %v130_v47 = vld [vmem:[%s129_s7] sm:$0x1]  ;;  %s299_s13 = scalar_lea.vmem %s1100_s2, %s609_s28  ;;  %s304_s21 = scalar_lea.vmem %s1100_s2, %s610_s10  ;;  %v395_v37 = vld [vmem:[%s1101_s3 + $0x28] sm:$0xff] }
  0x3d   :  { %v350_v45 = vld [vmem:[#allocation2 + $0x18] sm:$0xff]  ;;  %131 = vst.msk [vmem:[#allocation2 + $0xe] sm:$0x1] %vm39_vm1, %v130_v47  ;;  %v135_v48 = vld [vmem:[%s134_s12] sm:$0x1]  ;;  %s312_s6 = scalar_lea.vmem %s1099_s1, %s920_s30  ;;  %s319_s7 = scalar_lea.vmem %s1100_s2, %s922_s9 }
  0x3e   :  { %v362_v46 = vmul.f32 %v356_v44, %v350_v45  ;;  %v605_v49 = vld [vmem:[%s272_s19] ss:$0 sm:$0xff]  ;;  %136 = vst.msk [vmem:[#allocation2 + $0xf] sm:$0x1] %vm39_vm1, %v135_v48  ;;  %s324_s23 = scalar_lea.vmem %s1100_s2, %s924_s14  ;;  %s329_s1 = scalar_lea.vmem %s1100_s2, %s926_s15 }
  0x3f   :  { %278 = vst.msk [vmem:[#allocation3 + $0x24] sm:$0x3f] %vm35_vm0, %v605_v49  ;;  %v300_v51 = vld [vmem:[%s299_s13] sm:$0x1]  ;;  %s334_s29 = scalar_lea.vmem %s1100_s2, %s928_s16  ;;  %s339_s8 = scalar_lea.vmem %s1100_s2, %s930_s11 }
  0x40   :  { %v375_v50 = vsel %vm365_vm2, %v362_v46, 0.0  ;;  %v305_v52 = vld [vmem:[%s304_s21] sm:$0x1]  ;;  %301 = vst.msk [vmem:[#allocation2 + $0x28] sm:$0x1] %vm39_vm1, %v300_v51  ;;  %s344_s13 = scalar_lea.vmem %s1100_s2, %s935_s25  ;;  %s599_s27 = sld [smem:[#allocation5 + $0x26]] }
  0x41   :  { %376 = vadd.xlane.f32.xlu1 %v375_v50  ;;  %306 = vst.msk [vmem:[#allocation2 + $0x29] sm:$0x1] %vm39_vm1, %v305_v52  ;;  %v613_v53 = vld [vmem:[%s312_s6] ss:$0 sm:$0xff]  ;;  %s600_s16 = sld [smem:[#allocation5 + $0x27]]  ;;  %s601_s26 = sld [smem:[#allocation5 + $0x28]] }
  0x42   :  { %v320_v54 = vld [vmem:[%s319_s7] sm:$0x1]  ;;  %318 = vst.msk [vmem:[#allocation3 + $0x2a] sm:$0x3f] %vm35_vm0, %v613_v53  ;;  %s602_s11 = sld [smem:[#allocation5 + $0x29]]  ;;  %s604_s21 = sld [smem:[#allocation5 + $0x2b]] }
  0x43   :  { %321 = vst.msk [vmem:[#allocation2 + $0x2a] sm:$0x1] %vm39_vm1, %v320_v54  ;;  %v325_v55 = vld [vmem:[%s324_s23] sm:$0x1]  ;;  %s606_s24 = sld [smem:[#allocation5 + $0x2c]]  ;;  %s607_s22 = sld [smem:[#allocation5 + $0x2d]] }
  0x44   :  { %v330_v56 = vld [vmem:[%s329_s1] sm:$0x1]  ;;  %326 = vst.msk [vmem:[#allocation2 + $0x2b] sm:$0x1] %vm39_vm1, %v325_v55  ;;  %s990_s6 = sld [smem:[#allocation5 + $0x2e]] }
  0x45   :  { %331 = vst.msk [vmem:[#allocation2 + $0x2c] sm:$0x1] %vm39_vm1, %v330_v56  ;;  %v335_v57 = vld [vmem:[%s334_s29] sm:$0x1]  ;;  %v348_v61 = vld [vmem:[#allocation2 + $0x8] sm:$0xff] }
  0x46   :  { %v340_v58 = vld [vmem:[%s339_s8] sm:$0x1]  ;;  %336 = vst.msk [vmem:[#allocation2 + $0x2d] sm:$0x1] %vm39_vm1, %v335_v57  ;;  %v360_v62 = vmul.f32 %v354_v60, %v348_v61  ;;  %s249_s28 = scalar_lea.vmem %s1100_s2, %s599_s27  ;;  %v357_v12 = vld [vmem:[#allocation3 + $0x20] sm:$0xff] }
  0x47   :  { %341 = vst.msk [vmem:[#allocation2 + $0x2e] sm:$0x1] %vm39_vm1, %v340_v58  ;;  %v345_v59 = vld [vmem:[%s344_s13] sm:$0x1]  ;;  %s254_s18 = scalar_lea.vmem %s1100_s2, %s600_s16  ;;  %s259_s0 = scalar_lea.vmem %s1100_s2, %s601_s26 }
  0x48   :  { %346 = vst.msk [vmem:[#allocation2 + $0x2f] sm:$0x1] %vm39_vm1, %v345_v59  ;;  %v369_v63 = vsel %vm365_vm2, %v360_v62, 0.0  ;;  %v250_v1 = vld [vmem:[%s249_s28] sm:$0x1]  ;;  %s264_s9 = scalar_lea.vmem %s1100_s2, %s602_s11  ;;  %s279_s20 = scalar_lea.vmem %s1100_s2, %s604_s21 }
  0x49   :  { %v358_v0 = vld [vmem:[#allocation3 + $0x28] sm:$0xff]  ;;  %370 = vadd.xlane.f32.xlu0 %v369_v63  ;;  %251 = vst.msk [vmem:[#allocation2 + $0x20] sm:$0x1] %vm39_vm1, %v250_v1  ;;  %v255_v2 = vld [vmem:[%s254_s18] sm:$0x1]  ;;  %s284_s15 = scalar_lea.vmem %s1100_s2, %s606_s24  ;;  %s289_s16 = scalar_lea.vmem %s1100_s2, %s607_s22 }
  0x4a   :  { %v260_v3 = vld [vmem:[%s259_s0] sm:$0x1]  ;;  %256 = vst.msk [vmem:[#allocation2 + $0x21] sm:$0x1] %vm39_vm1, %v255_v2  ;;  %s294_s21 = scalar_lea.vmem %s1100_s2, %s990_s6 }
  0x4b   :  { %261 = vst.msk [vmem:[#allocation2 + $0x22] sm:$0x1] %vm39_vm1, %v260_v3  ;;  %v265_v5 = vld [vmem:[%s264_s9] sm:$0x1] }
  0x4c   :  { %v280_v6 = vld [vmem:[%s279_s20] sm:$0x1]  ;;  %266 = vst.msk [vmem:[#allocation2 + $0x23] sm:$0x1] %vm39_vm1, %v265_v5 }
  0x4d   :  { %281 = vst.msk [vmem:[#allocation2 + $0x24] sm:$0x1] %vm39_vm1, %v280_v6  ;;  %v285_v8 = vld [vmem:[%s284_s15] sm:$0x1] }
  0x4e   :  { %v290_v9 = vld [vmem:[%s289_s16] sm:$0x1]  ;;  %286 = vst.msk [vmem:[#allocation2 + $0x25] sm:$0x1] %vm39_vm1, %v285_v8  ;;  %v385_v8 = vld [vmem:[%s1102_s4 + $0x8] sm:$0xff] }
  0x4f   :  { %v352_v4 = vld [vmem:[#allocation2 + $0x28] sm:$0xff]  ;;  %291 = vst.msk [vmem:[#allocation2 + $0x26] sm:$0x1] %vm39_vm1, %v290_v9  ;;  %v295_v10 = vld [vmem:[%s294_s21] sm:$0x1] }
  0x50   :  { %v364_v7 = vmul.f32 %v358_v0, %v352_v4  ;;  %296 = vst.msk [vmem:[#allocation2 + $0x27] sm:$0x1] %vm39_vm1, %v295_v10  ;;  %v390_v16 = vld [vmem:[%s1101_s3] sm:$0xff] }
  0x51   :  { %v394_v48 = vld [vmem:[%s1101_s3 + $0x20] sm:$0xff] }
  0x52   :  { %v381_v11 = vsel %vm365_vm2, %v364_v7, 0.0  ;;  %v384_v10 = vld [vmem:[%s1102_s4] sm:$0xff] }
  0x53   :  { %382 = vadd.xlane.f32.xlu1 %v381_v11 }
  0x57   :  { %v351_v13 = vld [vmem:[#allocation2 + $0x20] sm:$0xff] }
  0x58   :  { %v363_v14 = vmul.f32 %v357_v12, %v351_v13 }
  0x5a   :  { %v378_v15 = vsel %vm365_vm2, %v363_v14, 0.0 }
  0x5b   :  { %379 = vadd.xlane.f32.xlu0 %v378_v15 }
  0xb8   :  { %v374_v18 = vpop.xlane.xlu1 %373 }
  0xb9   :  { %v1036_v21 = vmul.f32 %v392_v20, %v374_v18  ;;  %v386_v18 = vld [vmem:[%s1102_s4 + $0x10] sm:$0xff] }
  0xbb   :  { %v410_v25 = vand.u32 2147483647, %v1036_v21  ;;  %v404_v13 = vmin.f32 %v1036_v21, 0.0  ;;  %v387_v21 = vld [vmem:[%s1102_s4 + $0x18] sm:$0xff] }
  0xbd   :  { %v416_v28 = vsub.f32 0.0, %v410_v25 }
  0xbf   :  { %v424_v32 = vmul.f32 1.442695, %v416_v28 }
  0xc3   :  { %v368_v17 = vpop.xlane.xlu0 %367 }
  0xc4   :  { %v1031_v19 = vmul.f32 %v390_v16, %v368_v17 }
  0xc6   :  { %v408_v22 = vand.u32 2147483647, %v1031_v19  ;;  %v402_v2 = vmin.f32 %v1031_v19, 0.0 }
  0xc8   :  { %v414_v26 = vsub.f32 0.0, %v408_v22 }
  0xca   :  { %v420_v29 = vmul.f32 1.442695, %v414_v26 }
  0xcc   :  { %623 = vpow2.f32 %v420_v29 }
  0xcd   :  { %625 = vpow2.f32 %v424_v32 }
  0xce   :  { %v377_v24 = vpop.xlane.xlu1 %376 }
  0xcf   :  { %v1043_v27 = vmul.f32 %v393_v23, %v377_v24 }
  0xd1   :  { %v411_v30 = vand.u32 2147483647, %v1043_v27  ;;  %v405_v19 = vmin.f32 %v1043_v27, 0.0 }
  0xd3   :  { %v417_v33 = vsub.f32 0.0, %v411_v30 }
  0xd5   :  { %v426_v38 = vmul.f32 1.442695, %v417_v33 }
  0xd6   :  { %v371_v34 = vpop.xlane.xlu0 %370  ;;  %v624_v44 = vpop.eup %623 }
  0xd7   :  { %v397_v35 = vmul.f32 %v391_v31, %v371_v34  ;;  %627 = vpow2.f32 %v426_v38  ;;  %v432_v47 = vadd.f32 1.0, %v624_v44  ;;  %v626_v49 = vpop.eup %625 }
  0xd8   :  { %v434_v52 = vadd.f32 1.0, %v626_v49 }
  0xd9   :  { %v409_v36 = vand.u32 2147483647, %v397_v35  ;;  %v403_v3 = vmin.f32 %v397_v35, 0.0 }
  0xdb   :  { %v415_v39 = vsub.f32 0.0, %v409_v36  ;;  %v388_v36 = vld [vmem:[%s1102_s4 + $0x20] sm:$0xff] }
  0xdd   :  { %v422_v42 = vmul.f32 1.442695, %v415_v39 }
  0xdf   :  { %629 = vpow2.f32 %v422_v42 }
  0xe0   :  { %v383_v40 = vpop.xlane.xlu1 %382 }
  0xe1   :  { %v1052_v41 = vmul.f32 %v395_v37, %v383_v40  ;;  %v628_v53 = vpop.eup %627  ;;  %v389_v37 = vld [vmem:[%s1102_s4 + $0x28] sm:$0xff]  ;;  %s686_s4 = smov [#allocation6]  }
  0xe2   :  { %v435_v58 = vadd.f32 1.0, %v628_v53  ;;  %s492_s27 = sshll.u32 %s686_s4, 4  ;;  %s493_s27 = int_to_ptr.vmem [resolvable:$true] %s492_s27 }
  0xe3   :  { %v413_v43 = vand.u32 2147483647, %v1052_v41  ;;  %v407_v30 = vmin.f32 %v1052_v41, 0.0  ;;  %s659_s26 = scalar_lea.vmem %s493_s27, 16  ;;  %s663_s11 = scalar_lea.vmem %s493_s27, 32 }
  0xe4   :  { %p660_p5 = scmp.ne.s32.totalorder %s493_s27, %s659_s26  ;;  %p664_p6 = scmp.lt.s32.totalorder %s493_s27, %s493_s27 }
  0xe5   :  { %v419_v45 = vsub.f32 0.0, %v413_v43  ;;  %p665_p7 = scmp.lt.s32.totalorder %s663_s11, %s659_s26 }
  0xe7   :  { %v430_v46 = vmul.f32 1.442695, %v419_v45  ;;  %p666_p8 = por %p665_p7, %p664_p6 }
  0xe8   :  { %v380_v50 = vpop.xlane.xlu0 %379 }
  0xe9   :  { %631 = vpow2.f32 %v430_v46  ;;  %v400_v51 = vmul.f32 %v394_v48, %v380_v50  ;;  %v630_v55 = vpop.eup %629  ;;  %p667_p9 = pnand %p666_p8, %p660_p5 }
  0xea   :  { %633 = vlog2.f32 %v432_v47  ;;  %v433_v56 = vadd.f32 1.0, %v630_v55 }
  0xeb   :  { %v412_v54 = vand.u32 2147483647, %v400_v51  ;;  %635 = vlog2.f32 %v434_v52  ;;  %v406_v34 = vmin.f32 %v400_v51, 0.0 }
  0xec   :  { %637 = vlog2.f32 %v433_v56 }
  0xed   :  { %v418_v57 = vsub.f32 0.0, %v412_v54 }
  0xef   :  { %v428_v59 = vmul.f32 1.442695, %v418_v57 }
  0xf1   :  { %639 = vpow2.f32 %v428_v59 }
  0xf2   :  { %641 = vlog2.f32 %v435_v58 }
  0xf3   :  { %v632_v60 = vpop.eup %631 }
  0xf4   :  { %v634_v61 = vpop.eup %633  ;;  %v437_v62 = vadd.f32 1.0, %v632_v60 }
  0xf5   :  { %v439_v63 = vmul.f32 0.6931472, %v634_v61  ;;  %v636_v0 = vpop.eup %635 }
  0xf6   :  { %643 = vlog2.f32 %v437_v62  ;;  %v638_v1 = vpop.eup %637  ;;  %v443_v6 = vmul.f32 0.6931472, %v636_v0 }
  0xf7   :  { %v441_v4 = vmul.f32 0.6931472, %v638_v1  ;;  %v450_v7 = vsub.f32 %v402_v2, %v439_v63 }
  0xf8   :  { %v452_v15 = vsub.f32 %v404_v13, %v443_v6 }
  0xf9   :  { %v451_v11 = vsub.f32 %v403_v3, %v441_v4  ;;  %v456_v16 = vmul.f32 %v450_v7, %v384_v10 }
  0xfa   :  { %v458_v23 = vmul.f32 %v452_v15, %v386_v18 }
  0xfb   :  { %v640_v5 = vpop.eup %639  ;;  %v457_v14 = vmul.f32 %v451_v11, %v385_v8  ;;  %v463_v24 = vsel %vm462_vm3, %v456_v16, 0.0 }
  0xfc   :  { %v642_v9 = vpop.eup %641  ;;  %v436_v12 = vadd.f32 1.0, %v640_v5  ;;  %v466_v31 = vsel %vm462_vm3, %v458_v23, 0.0 }
  0xfd   :  { %v445_v17 = vmul.f32 0.6931472, %v642_v9  ;;  %v464_v20 = vsel %vm462_vm3, %v457_v14, 0.0 }
  0xfe   :  { %645 = vlog2.f32 %v436_v12  ;;  %v465_v26 = vadd.f32 %v464_v20, %v463_v24 }
  0xff   :  { %v453_v25 = vsub.f32 %v405_v19, %v445_v17 }
 0x100   :  { %v644_v22 = vpop.eup %643  ;;  %v467_v27 = vadd.f32 %v466_v31, %v465_v26 }
 0x101   :  { %v449_v28 = vmul.f32 0.6931472, %v644_v22  ;;  %v459_v29 = vmul.f32 %v453_v25, %v387_v21 }
 0x103   :  { %v455_v33 = vsub.f32 %v407_v30, %v449_v28  ;;  %v468_v39 = vsel %vm462_vm3, %v459_v29, 0.0 }
 0x104   :  { %v469_v40 = vadd.f32 %v468_v39, %v467_v27 }
 0x105   :  { %v461_v42 = vmul.f32 %v455_v33, %v389_v37 }
 0x107   :  { %v472_v45 = vsel %vm462_vm3, %v461_v42, 0.0 }
 0x108   :  { %v646_v32 = vpop.eup %645 }
 0x109   :  { %v447_v35 = vmul.f32 0.6931472, %v646_v32 }
 0x10b   :  { %v454_v38 = vsub.f32 %v406_v34, %v447_v35 }
 0x10d   :  { %v460_v41 = vmul.f32 %v454_v38, %v388_v36 }
 0x10f   :  { %v470_v43 = vsel %vm462_vm3, %v460_v41, 0.0 }
 0x110   :  { %v471_v44 = vadd.f32 %v470_v43, %v469_v40 }
 0x112   :  { %v473_v46 = vadd.f32 %v472_v45, %v471_v44 }
 0x114   :  { %474 = vadd.xlane.f32.xlu0 %v473_v46 }
 0x1a1   :  { %v475_v47 = vpop.xlane.xlu0 %474 }
 0x1a2   :  { %v476_v48 = vrot.slane %v475_v47, 4 }
 0x1a4   :  { %v477_v49 = vadd.f32 %v476_v48, %v475_v47 }
 0x1a6   :  { %v478_v50 = vrot.slane %v477_v49, 2 }
 0x1a8   :  { %v479_v51 = vadd.f32 %v478_v50, %v477_v49 }
 0x1aa   :  { %v480_v52 = vrot.slane %v479_v51, 1 }
 0x1ac   :  { %v481_v53 = vadd.f32 %v480_v52, %v479_v51 }
 0x1ae   :  { %619 = vpush %v481_v53 }
 0x1df   :  { %s620_s16 = spop %619 }
 0x1e0   :  { %v483_v54 = vstv %s620_s16 }
 0x1e1   :  { %485 = vst.msk [vmem:[#allocation6] sm:$0x1] %vm484_vm4, %v483_v54 }
 0x1e2   :  { %670 = shalt.err (!%p667_p9)
}
 0x1e3   :  { %s671_s22 = scalar_lea.hbm %s1103_s5, 16 }
 0x1e4   :  { %p672_p10 = scmp.ne.s32.totalorder %s1103_s5, %s671_s22  ;;  %p675_p11 = scmp.lt.u32.totalorder %s671_s22, %s1103_s5 }
 0x1e6   :  { %p677_p12 = pnand %p675_p11, %p672_p10 }
 0x1e8   :  { %680 = shalt.err (!%p677_p12)
}
 0x1e9   :  { %495 = dma.vmem_to_hbm [thread:$0]  %s493_s27, 16, %s1103_s5, [#allocation7]  }
 0x1ea   :  { %683 = dma.done.wait [#allocation7], 16  }
 0x1eb   :  { %684 = vsyncadd [#allocation7], 4294967280 }
 0x1ec   :  { %499 = vsyncpa [#allocation7], 1 }

</bundles_post_ra>
